<compile_context>
chip_gen: v7x
topology: tpu7x:2x2x1
jax: 0.10.0
libtpu: 0.0.40
codegen_flags: <defaults>
</compile_context>

<pallas_src>
import functools

import jax
import jax.numpy as jnp
from jax import lax
from jax.experimental import pallas as pl
from jax.experimental.pallas import tpu as pltpu

EPS = 1e-5          # nn.InstanceNorm2d default eps
LEAKY_SLOPE = 0.2   # nn.LeakyReLU(0.2)


# ----------------------------- Pallas kernel -------------------------------

def _make_kernel(k, stride, dilation, pad, h_in, w_in, h_out, w_out, cin, cout,
                 apply_act):
    """Fused (conv -> InstanceNorm2d(affine=False) -> LeakyReLU) for one image.

    x_ref:     (H, W, Cin)        unpadded f32 NHWC image (batch squeezed)
    w_ref:     (Cout, k*k*Cin)    f32 flattened conv weights (resident in VMEM)
    o_ref:     (Cout, Hout*Wout)  f32 output (channel-major -> NCHW for free)
    xpad_ref:  (Hp, Wp, Cin)      VMEM scratch: zero-padded image
    patch_ref: (P, k*k*Cin)       VMEM scratch: im2col patch tile
    """
    p = h_out * w_out

    def kernel(x_ref, w_ref, o_ref, xpad_ref, patch_ref):
        # ---- in-kernel zero padding (no jnp.pad HBM pass in the wrapper) ----
        xpad_ref[...] = jnp.zeros_like(xpad_ref)
        xpad_ref[pad:pad + h_in, pad:pad + w_in, :] = x_ref[...]

        # ---- im2col: assemble ONE (P, k*k*Cin) patch tile ------------------
        for kh in range(k):
            for kw in range(k):
                if stride == 1:
                    tap = xpad_ref[kh * dilation:kh * dilation + h_out,
                                   kw * dilation:kw * dilation + w_out, :]
                else:
                    # TODO(synk): stride>1 tap loads untested on hardware; the
                    # demo config uses stride=1.
                    tap = xpad_ref[pl.ds(kh * dilation, h_out, stride),
                                   pl.ds(kw * dilation, w_out, stride), :]
                j = kh * k + kw
                # (Hout, Wout, Cin) -> (P, Cin): layout-preserving here since
                # Wout (16) is a multiple of the f32 sublane count (8).
                patch_ref[:, j * cin:(j + 1) * cin] = tap.reshape(p, cin)

        # ---- single K = k*k*Cin matmul on the MXU, result is (Cout, P) -----
        # lhs (Cout, K) contracts with rhs (P, K) on their last dims (q.k^T
        # pattern) -> lane-dense (Cout, P) f32 accumulator, unmasked stores.
        acc = lax.dot_general(
            w_ref[...], patch_ref[...],
            dimension_numbers=(((1,), (1,)), ((), ())),
            preferred_element_type=jnp.float32)            # (Cout, P) f32

        # ---- InstanceNorm2d (affine=False), one-pass stats in f32 ----------
        inv_p = 1.0 / p
        mean = jnp.sum(acc, axis=1, keepdims=True) * inv_p
        ex2 = jnp.sum(acc * acc, axis=1, keepdims=True) * inv_p
        var = ex2 - mean * mean                 # biased variance (PyTorch IN)
        y = (acc - mean) * lax.rsqrt(var + EPS)

        if apply_act:                                        # LeakyReLU(0.2)
            y = jnp.where(y >= 0.0, y, LEAKY_SLOPE * y)
        o_ref[...] = y.astype(o_ref.dtype)

    return kernel


# ------------------------------ JAX wrapper ----------------------------------

def conv2d_layer_forward(x_nchw, weight_hwio, *, stride=1, dilation=1,
                         norm="in", act="leaky"):
    """Conv2dLayer.forward: NCHW in -> NCHW out (conv bias=False -> IN -> act)."""
    if norm != "in" or act != "leaky":
        # TODO(synk): only the default norm='in', act='leaky' branch of
        # Conv2dLayer is fused here; other norm/act choices not implemented.
        raise NotImplementedError("only norm='in', act='leaky' is implemented")

    k = weight_hwio.shape[0]
    cin, cout = weight_hwio.shape[2], weight_hwio.shape[3]
    pad = dilation * (k - 1) // 2

    n, _, h_in, w_in = x_nchw.shape
    h_out = (h_in + 2 * pad - dilation * (k - 1) - 1) // stride + 1
    w_out = (w_in + 2 * pad - dilation * (k - 1) - 1) // stride + 1
    p = h_out * w_out
    hp, wp = h_in + 2 * pad, w_in + 2 * pad

    # TODO(synk): the NCHW->NHWC transpose is the one remaining wrapper-side
    # HBM pass; padding and im2col live inside the kernel, no dtype casts.
    x_nhwc = jnp.transpose(x_nchw, (0, 2, 3, 1))

    # Single flattened resident weight tile (Cout, k*k*Cin). Row order of the
    # contraction axis is (kh, kw, ci) — matches the in-kernel patch columns.
    w_flat = jnp.transpose(weight_hwio.reshape(k * k * cin, cout))

    kernel = _make_kernel(k, stride, dilation, pad, h_in, w_in, h_out, w_out,
                          cin, cout, apply_act=True)

    out = pl.pallas_call(
        kernel,
        out_shape=jax.ShapeDtypeStruct((n, cout, p), jnp.float32),
        grid=(n,),
        in_specs=[
            # one unpadded image per grid step (fits VMEM trivially here)
            pl.BlockSpec((None, h_in, w_in, cin), lambda b: (b, 0, 0, 0)),
            # weights: constant index_map -> stay resident in VMEM across grid
            pl.BlockSpec((cout, k * k * cin), lambda b: (0, 0)),
        ],
        out_specs=pl.BlockSpec((None, cout, p), lambda b: (b, 0, 0)),
        scratch_shapes=[
            pltpu.VMEM((hp, wp, cin), jnp.float32),       # padded image
            pltpu.VMEM((p, k * k * cin), jnp.float32),    # im2col patch tile
        ],
        compiler_params=pltpu.CompilerParams(
            dimension_semantics=("parallel",),   # megacore sharding on v7x
            vmem_limit_bytes=32 * 1024 * 1024),
    )(x_nhwc, w_flat)

    # (N, Cout, P) is already channel-major: reshape to NCHW, no transpose.
    return out.reshape(n, cout, h_out, w_out)


# ------------------------------ init / reference -----------------------------

def init_conv2d_layer_params(key, in_ch, out_ch, k):
    """PyTorch Conv2d default init (uniform +-1/sqrt(fan_in)), bias=False, HWIO."""
    fan_in = in_ch * k * k
    bound = 1.0 / (fan_in ** 0.5)
    return jax.random.uniform(key, (k, k, in_ch, out_ch), jnp.float32,
                              -bound, bound)


def ref_conv2d_layer(x_nchw, weight_hwio, *, stride=1, dilation=1):
    """Pure-JAX f32 reference for Conv2dLayer (conv -> IN -> LeakyReLU)."""
    k = weight_hwio.shape[0]
    pad = dilation * (k - 1) // 2
    x = jnp.transpose(x_nchw, (0, 2, 3, 1))
    out = jax.lax.conv_general_dilated(
        x, weight_hwio, window_strides=(stride, stride),
        padding=[(pad, pad), (pad, pad)],
        rhs_dilation=(dilation, dilation),
        dimension_numbers=("NHWC", "HWIO", "NHWC"),
        precision=jax.lax.Precision.HIGHEST)
    mean = jnp.mean(out, axis=(1, 2), keepdims=True)
    var = jnp.mean(jnp.square(out - mean), axis=(1, 2), keepdims=True)
    y = (out - mean) * jax.lax.rsqrt(var + EPS)
    y = jnp.where(y >= 0.0, y, LEAKY_SLOPE * y)
    return jnp.transpose(y, (0, 3, 1, 2))


# --------------------------------- main ---------------------------------------

if __name__ == "__main__":
    key = jax.random.PRNGKey(0)
    k_x, k_w = jax.random.split(key)

    in_ch, out_ch, ksize, stride, dilation = 4, 8, 3, 1, 1
    x = jax.random.normal(k_x, (2, in_ch, 16, 16), jnp.float32)   # NCHW, torch-like
    weight = init_conv2d_layer_params(k_w, in_ch, out_ch, ksize)

    fwd = jax.jit(functools.partial(conv2d_layer_forward,
                                    stride=stride, dilation=dilation))
    out = jax.block_until_ready(fwd(x, weight))

    assert out.shape == (2, out_ch, 16, 16), out.shape
    ref = ref_conv2d_layer(x, weight, stride=stride, dilation=dilation)
    err = float(jnp.max(jnp.abs(out - ref)))
    assert err < 5e-2, f"max abs err {err}"

    print("KERNEL_OK")
</pallas_src>

<mosaic_0001>
module attributes {stable_mosaic.version = 11 : i64} {
  func.func @kernel(%arg0: i32, %arg1: memref<1x16x16x4xf32, #tpu.memory_space<vmem>>, %arg2: memref<8x36xf32, #tpu.memory_space<vmem>>, %arg3: memref<1x8x256xf32, #tpu.memory_space<vmem>>, %arg4: memref<18x18x4xf32, #tpu.memory_space<vmem>>, %arg5: memref<256x36xf32, #tpu.memory_space<vmem>>) attributes {dimension_semantics = [#tpu.dimension_semantics<parallel>], iteration_bounds = array<i64: 2>, scalar_prefetch = 0 : i64, scratch_operands = 2 : i64, tpu.core_type = #tpu.core_type<tc>, window_params = [{transform_indices = @transform_0, window_bounds = array<i64: 1, 16, 16, 4>}, {pipeline_mode = #tpu.pipeline_mode<synchronous>, transform_indices = @transform_1, window_bounds = array<i64: 8, 36>}, {transform_indices = @transform_2, window_bounds = array<i64: 1, 8, 256>}]} {
    %cst = arith.constant 0.000000e+00 : f32
    %0 = vector.broadcast %cst : f32 to vector<18x18x4xf32>
    %c0 = arith.constant 0 : index
    %c0_0 = arith.constant 0 : index
    %c0_1 = arith.constant 0 : index
    %1 = vector.load %arg4[%c0, %c0_0, %c0_1] : memref<18x18x4xf32, #tpu.memory_space<vmem>>, vector<18x18x4xf32>
    tpu.vector_store %arg4[%c0, %c0_0, %c0_1], %0 {strides = array<i32>} : memref<18x18x4xf32, #tpu.memory_space<vmem>>, vector<18x18x4xf32>,
    %c0_2 = arith.constant 0 : index
    %c0_3 = arith.constant 0 : index
    %c0_4 = arith.constant 0 : index
    %c0_5 = arith.constant 0 : index
    %2 = vector.load %arg1[%c0_2, %c0_3, %c0_4, %c0_5] : memref<1x16x16x4xf32, #tpu.memory_space<vmem>>, vector<1x16x16x4xf32>
    %3 = vector.shape_cast %2 : vector<1x16x16x4xf32> to vector<16x16x4xf32>
    %c1 = arith.constant 1 : index
    %c1_6 = arith.constant 1 : index
    %c0_7 = arith.constant 0 : index
    %4 = vector.load %arg4[%c1, %c1_6, %c0_7] : memref<18x18x4xf32, #tpu.memory_space<vmem>>, vector<16x16x4xf32>
    tpu.vector_store %arg4[%c1, %c1_6, %c0_7], %3 {strides = array<i32>} : memref<18x18x4xf32, #tpu.memory_space<vmem>>, vector<16x16x4xf32>,
    %c0_8 = arith.constant 0 : index
    %c0_9 = arith.constant 0 : index
    %c0_10 = arith.constant 0 : index
    %5 = vector.load %arg4[%c0_8, %c0_9, %c0_10] : memref<18x18x4xf32, #tpu.memory_space<vmem>>, vector<16x16x4xf32>
    %6 = vector.shape_cast %5 : vector<16x16x4xf32> to vector<256x4xf32>
    %c0_11 = arith.constant 0 : index
    %c0_12 = arith.constant 0 : index
    %7 = vector.load %arg5[%c0_11, %c0_12] : memref<256x36xf32, #tpu.memory_space<vmem>>, vector<256x4xf32>
    tpu.vector_store %arg5[%c0_11, %c0_12], %6 {strides = array<i32>} : memref<256x36xf32, #tpu.memory_space<vmem>>, vector<256x4xf32>,
    %c0_13 = arith.constant 0 : index
    %c1_14 = arith.constant 1 : index
    %c0_15 = arith.constant 0 : index
    %8 = vector.load %arg4[%c0_13, %c1_14, %c0_15] : memref<18x18x4xf32, #tpu.memory_space<vmem>>, vector<16x16x4xf32>
    %9 = vector.shape_cast %8 : vector<16x16x4xf32> to vector<256x4xf32>
    %c0_16 = arith.constant 0 : index
    %c4 = arith.constant 4 : index
    %10 = vector.load %arg5[%c0_16, %c4] : memref<256x36xf32, #tpu.memory_space<vmem>>, vector<256x4xf32>
    tpu.vector_store %arg5[%c0_16, %c4], %9 {strides = array<i32>} : memref<256x36xf32, #tpu.memory_space<vmem>>, vector<256x4xf32>,
    %c0_17 = arith.constant 0 : index
    %c2 = arith.constant 2 : index
    %c0_18 = arith.constant 0 : index
    %11 = vector.load %arg4[%c0_17, %c2, %c0_18] : memref<18x18x4xf32, #tpu.memory_space<vmem>>, vector<16x16x4xf32>
    %12 = vector.shape_cast %11 : vector<16x16x4xf32> to vector<256x4xf32>
    %c0_19 = arith.constant 0 : index
    %c8 = arith.constant 8 : index
    %13 = vector.load %arg5[%c0_19, %c8] : memref<256x36xf32, #tpu.memory_space<vmem>>, vector<256x4xf32>
    tpu.vector_store %arg5[%c0_19, %c8], %12 {strides = array<i32>} : memref<256x36xf32, #tpu.memory_space<vmem>>, vector<256x4xf32>,
    %c1_20 = arith.constant 1 : index
    %c0_21 = arith.constant 0 : index
    %c0_22 = arith.constant 0 : index
    %14 = vector.load %arg4[%c1_20, %c0_21, %c0_22] : memref<18x18x4xf32, #tpu.memory_space<vmem>>, vector<16x16x4xf32>
    %15 = vector.shape_cast %14 : vector<16x16x4xf32> to vector<256x4xf32>
    %c0_23 = arith.constant 0 : index
    %c12 = arith.constant 12 : index
    %16 = vector.load %arg5[%c0_23, %c12] : memref<256x36xf32, #tpu.memory_space<vmem>>, vector<256x4xf32>
    tpu.vector_store %arg5[%c0_23, %c12], %15 {strides = array<i32>} : memref<256x36xf32, #tpu.memory_space<vmem>>, vector<256x4xf32>,
    %c1_24 = arith.constant 1 : index
    %c1_25 = arith.constant 1 : index
    %c0_26 = arith.constant 0 : index
    %17 = vector.load %arg4[%c1_24, %c1_25, %c0_26] : memref<18x18x4xf32, #tpu.memory_space<vmem>>, vector<16x16x4xf32>
    %18 = vector.shape_cast %17 : vector<16x16x4xf32> to vector<256x4xf32>
    %c0_27 = arith.constant 0 : index
    %c16 = arith.constant 16 : index
    %19 = vector.load %arg5[%c0_27, %c16] : memref<256x36xf32, #tpu.memory_space<vmem>>, vector<256x4xf32>
    tpu.vector_store %arg5[%c0_27, %c16], %18 {strides = array<i32>} : memref<256x36xf32, #tpu.memory_space<vmem>>, vector<256x4xf32>,
    %c1_28 = arith.constant 1 : index
    %c2_29 = arith.constant 2 : index
    %c0_30 = arith.constant 0 : index
    %20 = vector.load %arg4[%c1_28, %c2_29, %c0_30] : memref<18x18x4xf32, #tpu.memory_space<vmem>>, vector<16x16x4xf32>
    %21 = vector.shape_cast %20 : vector<16x16x4xf32> to vector<256x4xf32>
    %c0_31 = arith.constant 0 : index
    %c20 = arith.constant 20 : index
    %22 = vector.load %arg5[%c0_31, %c20] : memref<256x36xf32, #tpu.memory_space<vmem>>, vector<256x4xf32>
    tpu.vector_store %arg5[%c0_31, %c20], %21 {strides = array<i32>} : memref<256x36xf32, #tpu.memory_space<vmem>>, vector<256x4xf32>,
    %c2_32 = arith.constant 2 : index
    %c0_33 = arith.constant 0 : index
    %c0_34 = arith.constant 0 : index
    %23 = vector.load %arg4[%c2_32, %c0_33, %c0_34] : memref<18x18x4xf32, #tpu.memory_space<vmem>>, vector<16x16x4xf32>
    %24 = vector.shape_cast %23 : vector<16x16x4xf32> to vector<256x4xf32>
    %c0_35 = arith.constant 0 : index
    %c24 = arith.constant 24 : index
    %25 = vector.load %arg5[%c0_35, %c24] : memref<256x36xf32, #tpu.memory_space<vmem>>, vector<256x4xf32>
    tpu.vector_store %arg5[%c0_35, %c24], %24 {strides = array<i32>} : memref<256x36xf32, #tpu.memory_space<vmem>>, vector<256x4xf32>,
    %c2_36 = arith.constant 2 : index
    %c1_37 = arith.constant 1 : index
    %c0_38 = arith.constant 0 : index
    %26 = vector.load %arg4[%c2_36, %c1_37, %c0_38] : memref<18x18x4xf32, #tpu.memory_space<vmem>>, vector<16x16x4xf32>
    %27 = vector.shape_cast %26 : vector<16x16x4xf32> to vector<256x4xf32>
    %c0_39 = arith.constant 0 : index
    %c28 = arith.constant 28 : index
    %28 = vector.load %arg5[%c0_39, %c28] : memref<256x36xf32, #tpu.memory_space<vmem>>, vector<256x4xf32>
    tpu.vector_store %arg5[%c0_39, %c28], %27 {strides = array<i32>} : memref<256x36xf32, #tpu.memory_space<vmem>>, vector<256x4xf32>,
    %c2_40 = arith.constant 2 : index
    %c2_41 = arith.constant 2 : index
    %c0_42 = arith.constant 0 : index
    %29 = vector.load %arg4[%c2_40, %c2_41, %c0_42] : memref<18x18x4xf32, #tpu.memory_space<vmem>>, vector<16x16x4xf32>
    %30 = vector.shape_cast %29 : vector<16x16x4xf32> to vector<256x4xf32>
    %c0_43 = arith.constant 0 : index
    %c32 = arith.constant 32 : index
    %31 = vector.load %arg5[%c0_43, %c32] : memref<256x36xf32, #tpu.memory_space<vmem>>, vector<256x4xf32>
    tpu.vector_store %arg5[%c0_43, %c32], %30 {strides = array<i32>} : memref<256x36xf32, #tpu.memory_space<vmem>>, vector<256x4xf32>,
    %c0_44 = arith.constant 0 : index
    %c0_45 = arith.constant 0 : index
    %32 = vector.load %arg2[%c0_44, %c0_45] : memref<8x36xf32, #tpu.memory_space<vmem>>, vector<8x36xf32>
    %c0_46 = arith.constant 0 : index
    %c0_47 = arith.constant 0 : index
    %33 = vector.load %arg5[%c0_46, %c0_47] : memref<256x36xf32, #tpu.memory_space<vmem>>, vector<256x36xf32>
    %cst_48 = arith.constant dense<0.000000e+00> : vector<8x256xf32>
    %34 = tpu.matmul %32, %33, %cst_48 {dimension_numbers = #tpu.dot_dimension_numbers<[1], [1], [0], [0], [0, 0, 1, 0], [], []>} : vector<8x36xf32>, vector<256x36xf32>, vector<8x256xf32> -> vector<8x256xf32>
    %cst_49 = arith.constant dense<0.000000e+00> : vector<8xf32>
    %35 = vector.multi_reduction <add>, %34, %cst_49 [1] : vector<8x256xf32> to vector<8xf32>
    %36 = vector.shape_cast %35 : vector<8xf32> to vector<8x1xf32>
    %cst_50 = arith.constant 3.906250e-03 : f32
    %37 = vector.broadcast %cst_50 : f32 to vector<8x1xf32>
    %38 = arith.mulf %36, %37 : vector<8x1xf32>
    %39 = arith.mulf %34, %34 : vector<8x256xf32>
    %cst_51 = arith.constant dense<0.000000e+00> : vector<8xf32>
    %40 = vector.multi_reduction <add>, %39, %cst_51 [1] : vector<8x256xf32> to vector<8xf32>
    %41 = vector.shape_cast %40 : vector<8xf32> to vector<8x1xf32>
    %cst_52 = arith.constant 3.906250e-03 : f32
    %42 = vector.broadcast %cst_52 : f32 to vector<8x1xf32>
    %43 = arith.mulf %41, %42 : vector<8x1xf32>
    %44 = arith.mulf %38, %38 : vector<8x1xf32>
    %45 = arith.subf %43, %44 : vector<8x1xf32>
    %46 = vector.broadcast %38 : vector<8x1xf32> to vector<8x256xf32>
    %47 = arith.subf %34, %46 : vector<8x256xf32>
    %cst_53 = arith.constant 9.99999974E-6 : f32
    %48 = vector.broadcast %cst_53 : f32 to vector<8x1xf32>
    %49 = arith.addf %45, %48 : vector<8x1xf32>
    %50 = math.rsqrt %49 : vector<8x1xf32>
    %51 = vector.broadcast %50 : vector<8x1xf32> to vector<8x256xf32>
    %52 = arith.mulf %47, %51 : vector<8x256xf32>
    %cst_54 = arith.constant 0.000000e+00 : f32
    %53 = vector.broadcast %cst_54 : f32 to vector<8x256xf32>
    %54 = arith.cmpf oge, %52, %53 : vector<8x256xf32>
    %cst_55 = arith.constant 2.000000e-01 : f32
    %55 = vector.broadcast %cst_55 : f32 to vector<8x256xf32>
    %56 = arith.mulf %55, %52 : vector<8x256xf32>
    %57 = arith.select %54, %52, %56 : vector<8x256xi1>, vector<8x256xf32>
    %c0_56 = arith.constant 0 : index
    %c0_57 = arith.constant 0 : index
    %c0_58 = arith.constant 0 : index
    %58 = vector.load %arg3[%c0_56, %c0_57, %c0_58] : memref<1x8x256xf32, #tpu.memory_space<vmem>>, vector<1x8x256xf32>
    %59 = vector.shape_cast %58 : vector<1x8x256xf32> to vector<8x256xf32>
    %60 = vector.shape_cast %57 : vector<8x256xf32> to vector<1x8x256xf32>
    tpu.vector_store %arg3[%c0_56, %c0_57, %c0_58], %60 {strides = array<i32>} : memref<1x8x256xf32, #tpu.memory_space<vmem>>, vector<1x8x256xf32>,
    return
  }
  func.func @transform_0(%arg0: i32) -> (i32, i32, i32, i32) {
    %c0_i32 = arith.constant 0 : i32
    %c0_i32_0 = arith.constant 0 : i32
    %c0_i32_1 = arith.constant 0 : i32
    %c0_i32_2 = arith.constant 0 : i32
    return %arg0, %c0_i32, %c0_i32_0, %c0_i32_1 : i32, i32, i32, i32
  }
  func.func @transform_1(%arg0: i32) -> (i32, i32) {
    %c0_i32 = arith.constant 0 : i32
    %c0_i32_0 = arith.constant 0 : i32
    %c0_i32_1 = arith.constant 0 : i32
    return %c0_i32, %c0_i32_0 : i32, i32
  }
  func.func @transform_2(%arg0: i32) -> (i32, i32, i32) {
    %c0_i32 = arith.constant 0 : i32
    %c0_i32_0 = arith.constant 0 : i32
    %c0_i32_1 = arith.constant 0 : i32
    return %arg0, %c0_i32, %c0_i32_0 : i32, i32, i32
  }
}

</mosaic_0001>

<bundles_post_ra>
// kernel: conv2d_layer_forward.1
= control target key start
LH: loop header
LB: loop body
LE: loop exit
PB: predicated region body
PF: predicated region fallthrough
CT: control target
= control target key end

     0   :  { %s2338_s9 = smov 0   ;;  %s3487_s0 = inlined_call_operand.vmem [shape: f32[2,16,16,4], index: 0, kind: input, shape index: {}]   ;;  %s3488_s1 = inlined_call_operand.vmem [shape: f32[8,36], index: 1, kind: input, shape index: {}]   ;;  %s3489_s2 = inlined_call_operand.vmem [shape: f32[2,8,256], index: 2, kind: output, shape index: {}]  }
   0x1 LB: > { %s2159_s10 = sadd.s32 4294967295, %s2312_s9   ;;  %p2163_p0 = scmp.ge.s32.totalorder %s2312_s9, 1  ;;  %s2312_s9 = sphi %s2338_s9, %s12_s9  }
   0x2   : > { %p112_p1 = scmp.lt.s32.totalorder %s2312_s9, 3 }
   0x4   : > { %p113_p2 = pnand %p2163_p0, %p112_p1 }
   0x5   : > { %vm144_vm0 = vcmask (!%p113_p2), 31744   ;;  %vm147_vm1 = vcmask (!%p113_p2), 25600   ;;  %p2348_p3 = scmp.lt.s32.totalorder (!%p113_p2), %s2159_s10, 1  ;;  %v2314_v0 = vmov (!%p113_p2), 0.0   ;;  %s2315_s16 = smov (!%p113_p2), 4   ;;  %vm489_vm2 = vcmask (!%p113_p2), 64544  }
   0x6   : > { %116 = sbr.rel (%p113_p2) target bundleno = 1063 (0x427), region = 28  ;;  %145 = vst.msk [vmem:[#allocation2] sm:$0xff] (!%p113_p2), %vm144_vm0, %v2314_v0  ;;  %146 = vst.msk [vmem:[#allocation2 + $0x8] sm:$0xff] (!%p113_p2), %vm144_vm0, %v2314_v0  ;;  %s2316_s17 = smov (!%p113_p2), 8   ;;  %vm682_vm3 = vcmask (!%p113_p2), 97344   ;;  %vm875_vm4 = vcmask (!%p113_p2), 130144  }
   0x7   : > { %149 = vst.msk [vmem:[#allocation2 + $0x18] sm:$0xff] (!%p113_p2), %vm144_vm0, %v2314_v0  ;;  %150 = vst.msk [vmem:[#allocation2 + $0x20] sm:$0xff] (!%p113_p2), %vm144_vm0, %v2314_v0  ;;  %s2317_s18 = smov (!%p113_p2), 12   ;;  %s2318_s19 = smov (!%p113_p2), 16   ;;  %vm1068_vm5 = vcmask (!%p113_p2), 162944   ;;  %vm1261_vm6 = vcmask (!%p113_p2), 195744  }
   0x8   : > { %152 = vst.msk [vmem:[#allocation2 + $0x30] sm:$0xff] (!%p113_p2), %vm144_vm0, %v2314_v0  ;;  %153 = vst.msk [vmem:[#allocation2 + $0x38] sm:$0xff] (!%p113_p2), %vm144_vm0, %v2314_v0  ;;  %s2319_s20 = smov (!%p113_p2), 20   ;;  %s2320_s21 = smov (!%p113_p2), 24   ;;  %vm1455_vm7 = vcmask (!%p113_p2), 228544   ;;  %vm1648_vm8 = vcmask (!%p113_p2), 261344  }
   0x9   : > { %155 = vst.msk [vmem:[#allocation2 + $0x48] sm:$0xff] (!%p113_p2), %vm144_vm0, %v2314_v0  ;;  %156 = vst.msk [vmem:[#allocation2 + $0x50] sm:$0xff] (!%p113_p2), %vm144_vm0, %v2314_v0  ;;  %s2321_s22 = smov (!%p113_p2), 28   ;;  %s2322_s23 = smov (!%p113_p2), 32   ;;  %vm1841_vm9 = vcmask (!%p113_p2), 294144   ;;  %vm1907_vm10 = vcmask (!%p113_p2), 293888  }
   0xa   : > { %158 = vst.msk [vmem:[#allocation2 + $0x60] sm:$0xff] (!%p113_p2), %vm144_vm0, %v2314_v0  ;;  %159 = vst.msk [vmem:[#allocation2 + $0x68] sm:$0xff] (!%p113_p2), %vm144_vm0, %v2314_v0 }
   0xb   : > { %161 = vst.msk [vmem:[#allocation2 + $0x78] sm:$0xff] (!%p113_p2), %vm144_vm0, %v2314_v0  ;;  %162 = vst.msk [vmem:[#allocation2 + $0x80] sm:$0xff] (!%p113_p2), %vm144_vm0, %v2314_v0 }
   0xc   : > { %164 = vst.msk [vmem:[#allocation2 + $0x90] sm:$0xff] (!%p113_p2), %vm144_vm0, %v2314_v0  ;;  %165 = vst.msk [vmem:[#allocation2 + $0x98] sm:$0xff] (!%p113_p2), %vm144_vm0, %v2314_v0 }
   0xd   : > { %167 = vst.msk [vmem:[#allocation2 + $0xa8] sm:$0xff] %vm144_vm0, %v2314_v0  ;;  %168 = vst.msk [vmem:[#allocation2 + $0xb0] sm:$0xff] %vm144_vm0, %v2314_v0  ;;  %s3494_s10 = smov (!%p2348_p3, %s2159_s10), 1  ;;  %v329_v7 = vld [vmem:[#allocation2 + $0x1] sm:$0xff] }
   0xe   : > { %170 = vst.msk [vmem:[#allocation2 + $0xc0] sm:$0xff] %vm144_vm0, %v2314_v0  ;;  %171 = vst.msk [vmem:[#allocation2 + $0xc8] sm:$0xff] %vm144_vm0, %v2314_v0  ;;  %s2203_s12 = sshll.u32 %s3494_s10, 8  ;;  %393 = vrot.lane.b32.xlu0 %v329_v7, %s2315_s16  ;;  %v265_v50 = vld [vmem:[#allocation2] sm:$0xff]  ;;  %v266_v54 = vld [vmem:[#allocation2 + $0x8] sm:$0xff]  ;;  %s2204_s26 = sshll.u32 %s3494_s10, 4 }
   0xf   : > { %173 = vst.msk [vmem:[#allocation2 + $0xd8] sm:$0xff] %vm144_vm0, %v2314_v0  ;;  %174 = vst.msk [vmem:[#allocation2 + $0xe0] sm:$0xff] %vm144_vm0, %v2314_v0  ;;  %s2416_s15 = scalar_lea.vmem %s3487_s0, %s2203_s12  ;;  %s143_s29 = scalar_lea.vmem %s3489_s2, %s2204_s26 }
  0x10   : > { %176 = vst.msk [vmem:[#allocation2 + $0xf0] sm:$0xff] %vm144_vm0, %v2314_v0  ;;  %177 = vst.msk [vmem:[#allocation2 + $0xf8] sm:$0xff] %vm144_vm0, %v2314_v0  ;;  %v200_v1 = vld [vmem:[%s2416_s15] sm:$0xff]  ;;  %v202_v2 = vld [vmem:[%s2416_s15 + $0x10] sm:$0xff] }
  0x11   : > { %179 = vst.msk [vmem:[#allocation2 + $0x108] sm:$0xff] %vm144_vm0, %v2314_v0  ;;  %180 = vst.msk [vmem:[#allocation2 + $0x110] sm:$0xff] %vm144_vm0, %v2314_v0  ;;  %v201_v3 = vld [vmem:[%s2416_s15 + $0x8] sm:$0xff]  ;;  %v204_v4 = vld [vmem:[%s2416_s15 + $0x20] sm:$0xff] }
  0x12   : > { %182 = vst.msk [vmem:[#allocation2 + $0x120] sm:$0xff] %vm144_vm0, %v2314_v0  ;;  %183 = vst.msk [vmem:[#allocation2 + $0x128] sm:$0xff] %vm144_vm0, %v2314_v0  ;;  %v203_v5 = vld [vmem:[%s2416_s15 + $0x18] sm:$0xff]  ;;  %v206_v6 = vld [vmem:[%s2416_s15 + $0x30] sm:$0xff] }
  0x13   : > { %185 = vst.msk [vmem:[#allocation2 + $0x138] sm:$0xff] %vm144_vm0, %v2314_v0  ;;  %186 = vst.msk [vmem:[#allocation2 + $0x140] sm:$0xff] %vm144_vm0, %v2314_v0  ;;  %v205_v9 = vld [vmem:[%s2416_s15 + $0x28] sm:$0xff]  ;;  %v208_v10 = vld [vmem:[%s2416_s15 + $0x40] sm:$0xff] }
  0x14   : > { %188 = vst.msk [vmem:[#allocation2 + $0x150] sm:$0xff] %vm144_vm0, %v2314_v0  ;;  %189 = vst.msk [vmem:[#allocation2 + $0x158] sm:$0xff] %vm144_vm0, %v2314_v0  ;;  %v207_v11 = vld [vmem:[%s2416_s15 + $0x38] sm:$0xff]  ;;  %v210_v12 = vld [vmem:[%s2416_s15 + $0x50] sm:$0xff] }
  0x15   : > { %191 = vst.msk [vmem:[#allocation2 + $0x168] sm:$0xff] %vm144_vm0, %v2314_v0  ;;  %192 = vst.msk [vmem:[#allocation2 + $0x170] sm:$0xff] %vm144_vm0, %v2314_v0  ;;  %v209_v13 = vld [vmem:[%s2416_s15 + $0x48] sm:$0xff]  ;;  %v212_v14 = vld [vmem:[%s2416_s15 + $0x60] sm:$0xff] }
  0x16   : > { %194 = vst.msk [vmem:[#allocation2 + $0x180] sm:$0xff] %vm144_vm0, %v2314_v0  ;;  %195 = vst.msk [vmem:[#allocation2 + $0x188] sm:$0xff] %vm144_vm0, %v2314_v0  ;;  %v211_v15 = vld [vmem:[%s2416_s15 + $0x58] sm:$0xff]  ;;  %v214_v16 = vld [vmem:[%s2416_s15 + $0x70] sm:$0xff] }
  0x17   : > { %197 = vst.msk [vmem:[#allocation2 + $0x198] sm:$0xff] %vm144_vm0, %v2314_v0  ;;  %198 = vst.msk [vmem:[#allocation2 + $0x1a0] sm:$0xff] %vm144_vm0, %v2314_v0  ;;  %v213_v17 = vld [vmem:[%s2416_s15 + $0x68] sm:$0xff]  ;;  %v216_v18 = vld [vmem:[%s2416_s15 + $0x80] sm:$0xff] }
  0x18   : > { %148 = vst.msk [vmem:[#allocation2 + $0x10] sm:$0x3] %vm147_vm1, %v2314_v0  ;;  %151 = vst.msk [vmem:[#allocation2 + $0x28] sm:$0x3] %vm147_vm1, %v2314_v0  ;;  %v215_v19 = vld [vmem:[%s2416_s15 + $0x78] sm:$0xff]  ;;  %v218_v20 = vld [vmem:[%s2416_s15 + $0x90] sm:$0xff] }
  0x19   : > { %154 = vst.msk [vmem:[#allocation2 + $0x40] sm:$0x3] %vm147_vm1, %v2314_v0  ;;  %157 = vst.msk [vmem:[#allocation2 + $0x58] sm:$0x3] %vm147_vm1, %v2314_v0  ;;  %v217_v21 = vld [vmem:[%s2416_s15 + $0x88] sm:$0xff]  ;;  %v220_v22 = vld [vmem:[%s2416_s15 + $0xa0] sm:$0xff] }
  0x1a   : > { %160 = vst.msk [vmem:[#allocation2 + $0x70] sm:$0x3] %vm147_vm1, %v2314_v0  ;;  %163 = vst.msk [vmem:[#allocation2 + $0x88] sm:$0x3] %vm147_vm1, %v2314_v0  ;;  %v219_v23 = vld [vmem:[%s2416_s15 + $0x98] sm:$0xff]  ;;  %v222_v24 = vld [vmem:[%s2416_s15 + $0xb0] sm:$0xff] }
  0x1b   : > { %166 = vst.msk [vmem:[#allocation2 + $0xa0] sm:$0x3] %vm147_vm1, %v2314_v0  ;;  %169 = vst.msk [vmem:[#allocation2 + $0xb8] sm:$0x3] %vm147_vm1, %v2314_v0  ;;  %v221_v28 = vld [vmem:[%s2416_s15 + $0xa8] sm:$0xff]  ;;  %v224_v29 = vld [vmem:[%s2416_s15 + $0xc0] sm:$0xff] }
  0x1c   : > { %172 = vst.msk [vmem:[#allocation2 + $0xd0] sm:$0x3] %vm147_vm1, %v2314_v0  ;;  %175 = vst.msk [vmem:[#allocation2 + $0xe8] sm:$0x3] %vm147_vm1, %v2314_v0  ;;  %v223_v33 = vld [vmem:[%s2416_s15 + $0xb8] sm:$0xff]  ;;  %v226_v34 = vld [vmem:[%s2416_s15 + $0xd0] sm:$0xff] }
  0x1d   : > { %178 = vst.msk [vmem:[#allocation2 + $0x100] sm:$0x3] %vm147_vm1, %v2314_v0  ;;  %181 = vst.msk [vmem:[#allocation2 + $0x118] sm:$0x3] %vm147_vm1, %v2314_v0  ;;  %v225_v35 = vld [vmem:[%s2416_s15 + $0xc8] sm:$0xff]  ;;  %v228_v36 = vld [vmem:[%s2416_s15 + $0xe0] sm:$0xff] }
  0x1e   : > { %184 = vst.msk [vmem:[#allocation2 + $0x130] sm:$0x3] %vm147_vm1, %v2314_v0  ;;  %187 = vst.msk [vmem:[#allocation2 + $0x148] sm:$0x3] %vm147_vm1, %v2314_v0  ;;  %v227_v37 = vld [vmem:[%s2416_s15 + $0xd8] sm:$0xff]  ;;  %v229_v39 = vld [vmem:[%s2416_s15 + $0xe8] sm:$0xff] }
  0x1f   : > { %190 = vst.msk [vmem:[#allocation2 + $0x160] sm:$0x3] %vm147_vm1, %v2314_v0  ;;  %193 = vst.msk [vmem:[#allocation2 + $0x178] sm:$0x3] %vm147_vm1, %v2314_v0  ;;  %v330_v8 = vld [vmem:[#allocation2 + $0x9] sm:$0xff] }
  0x20   : > { %196 = vst.msk [vmem:[#allocation2 + $0x190] sm:$0x3] %vm147_vm1, %v2314_v0  ;;  %199 = vst.msk [vmem:[#allocation2 + $0x1a8] sm:$0x3] %vm147_vm1, %v2314_v0  ;;  %395 = vrot.lane.b32.xlu0 %v330_v8, %s2315_s16 }
  0x21   : > { %233 = vst.msk [vmem:[#allocation2 + $0x19] sm:$0xff] %vm144_vm0, %v200_v1  ;;  %235 = vst.msk [vmem:[#allocation2 + $0x31] sm:$0xff] %vm144_vm0, %v202_v2 }
  0x22   : > { %234 = vst.msk [vmem:[#allocation2 + $0x21] sm:$0xff] %vm144_vm0, %v201_v3  ;;  %237 = vst.msk [vmem:[#allocation2 + $0x49] sm:$0xff] %vm144_vm0, %v204_v4 }
  0x23   : > { %236 = vst.msk [vmem:[#allocation2 + $0x39] sm:$0xff] %vm144_vm0, %v203_v5  ;;  %239 = vst.msk [vmem:[#allocation2 + $0x61] sm:$0xff] %vm144_vm0, %v206_v6 }
  0x24   : > { %238 = vst.msk [vmem:[#allocation2 + $0x51] sm:$0xff] %vm144_vm0, %v205_v9  ;;  %241 = vst.msk [vmem:[#allocation2 + $0x79] sm:$0xff] %vm144_vm0, %v208_v10 }
  0x25   : > { %240 = vst.msk [vmem:[#allocation2 + $0x69] sm:$0xff] %vm144_vm0, %v207_v11  ;;  %243 = vst.msk [vmem:[#allocation2 + $0x91] sm:$0xff] %vm144_vm0, %v210_v12 }
  0x26   : > { %242 = vst.msk [vmem:[#allocation2 + $0x81] sm:$0xff] %vm144_vm0, %v209_v13  ;;  %245 = vst.msk [vmem:[#allocation2 + $0xa9] sm:$0xff] %vm144_vm0, %v212_v14 }
  0x27   : > { %244 = vst.msk [vmem:[#allocation2 + $0x99] sm:$0xff] %vm144_vm0, %v211_v15  ;;  %247 = vst.msk [vmem:[#allocation2 + $0xc1] sm:$0xff] %vm144_vm0, %v214_v16 }
  0x28   : > { %246 = vst.msk [vmem:[#allocation2 + $0xb1] sm:$0xff] %vm144_vm0, %v213_v17  ;;  %249 = vst.msk [vmem:[#allocation2 + $0xd9] sm:$0xff] %vm144_vm0, %v216_v18  ;;  %v2461_v25 = vld [vmem:[#allocation2 + $0x19] sm:$0xff]  ;;  %v2463_v26 = vld [vmem:[#allocation2 + $0x31] sm:$0xff] }
  0x29   : > { %248 = vst.msk [vmem:[#allocation2 + $0xc9] sm:$0xff] %vm144_vm0, %v215_v19  ;;  %251 = vst.msk [vmem:[#allocation2 + $0xf1] sm:$0xff] %vm144_vm0, %v218_v20  ;;  %397 = vrot.lane.b32.xlu1 %v2461_v25, %s2315_s16  ;;  %v2470_v27 = vld [vmem:[#allocation2 + $0x21] sm:$0xff]  ;;  %401 = vrot.lane.b32.xlu0 %v2463_v26, %s2315_s16  ;;  %v2478_v30 = vld [vmem:[#allocation2 + $0x49] sm:$0xff] }
  0x2a   : > { %250 = vst.msk [vmem:[#allocation2 + $0xe1] sm:$0xff] %vm144_vm0, %v217_v21  ;;  %253 = vst.msk [vmem:[#allocation2 + $0x109] sm:$0xff] %vm144_vm0, %v220_v22  ;;  %v2482_v31 = vld [vmem:[#allocation2 + $0x39] sm:$0xff]  ;;  %v2486_v32 = vld [vmem:[#allocation2 + $0x61] sm:$0xff] }
  0x2b   : > { %252 = vst.msk [vmem:[#allocation2 + $0xf9] sm:$0xff] %vm144_vm0, %v219_v23  ;;  %255 = vst.msk [vmem:[#allocation2 + $0x121] sm:$0xff] %vm144_vm0, %v222_v24  ;;  %v2498_v38 = vld [vmem:[#allocation2 + $0x51] sm:$0xff]  ;;  %v339_v40 = vld [vmem:[#allocation2 + $0x79] sm:$0xff] }
  0x2c   : > { %254 = vst.msk [vmem:[#allocation2 + $0x111] sm:$0xff] %vm144_vm0, %v221_v28  ;;  %257 = vst.msk [vmem:[#allocation2 + $0x139] sm:$0xff] %vm144_vm0, %v224_v29  ;;  %v2508_v41 = vld [vmem:[#allocation2 + $0x69] sm:$0xff]  ;;  %v2515_v44 = vld [vmem:[#allocation2 + $0x20] sm:$0xff] }
  0x2d   : > { %399 = vrot.lane.b32.xlu1 %v2470_v27, %s2315_s16  ;;  %405 = vrot.lane.b32.xlu0 %v2478_v30, %s2315_s16  ;;  %256 = vst.msk [vmem:[#allocation2 + $0x129] sm:$0xff] %vm144_vm0, %v223_v33  ;;  %259 = vst.msk [vmem:[#allocation2 + $0x151] sm:$0xff] %vm144_vm0, %v226_v34  ;;  %v2517_v45 = vld [vmem:[#allocation2 + $0x18] sm:$0xff]  ;;  %v340_v47 = vld [vmem:[#allocation2 + $0x81] sm:$0xff] }
  0x2e   : > { %258 = vst.msk [vmem:[#allocation2 + $0x141] sm:$0xff] %vm144_vm0, %v225_v35  ;;  %261 = vst.msk [vmem:[#allocation2 + $0x169] sm:$0xff] %vm144_vm0, %v228_v36  ;;  %v341_v46 = vld [vmem:[#allocation2 + $0x91] sm:$0xff]  ;;  %v343_v53 = vld [vmem:[#allocation2 + $0xa9] sm:$0xff] }
  0x2f   : > { %260 = vst.msk [vmem:[#allocation2 + $0x159] sm:$0xff] %vm144_vm0, %v227_v37  ;;  %262 = vst.msk [vmem:[#allocation2 + $0x171] sm:$0xff] %vm144_vm0, %v229_v39  ;;  %v2512_v43 = vld [vmem:[#allocation2 + $0xd8] sm:$0xff]  ;;  %v2536_v52 = vld [vmem:[#allocation2 + $0x30] sm:$0xff] }
  0x30   : > { %315 = vst.msk [vmem:[#allocation3 + $0x90] sm:$0xff] %vm144_vm0, %v2512_v43  ;;  %299 = vst.msk [vmem:[#allocation3 + $0x10] sm:$0xff] %vm144_vm0, %v2517_v45  ;;  %v2531_v49 = vld [vmem:[#allocation2 + $0xf0] sm:$0xff]  ;;  %v2534_v51 = vld [vmem:[#allocation2 + $0x38] sm:$0xff] }
  0x31   : > { %403 = vrot.lane.b32.xlu1 %v2482_v31, %s2315_s16  ;;  %409 = vrot.lane.b32.xlu0 %v2486_v32, %s2315_s16  ;;  %v2510_v42 = vld [vmem:[#allocation2 + $0xe0] sm:$0xff]  ;;  %300 = vst.msk [vmem:[#allocation3 + $0x18] sm:$0xff] %vm144_vm0, %v2515_v44  ;;  %317 = vst.msk [vmem:[#allocation3 + $0xa0] sm:$0xff] %vm144_vm0, %v2531_v49  ;;  %v2545_v55 = vld [vmem:[#allocation2 + $0x48] sm:$0xff] }
  0x32   : > { %316 = vst.msk [vmem:[#allocation3 + $0x98] sm:$0xff] %vm144_vm0, %v2510_v42  ;;  %v2529_v48 = vld [vmem:[#allocation2 + $0xf8] sm:$0xff]  ;;  %297 = vst.msk [vmem:[#allocation3] sm:$0xff] %vm144_vm0, %v265_v50  ;;  %v2553_v57 = vld [vmem:[#allocation2 + $0x60] sm:$0xff] }
  0x33   : > { %318 = vst.msk [vmem:[#allocation3 + $0xa8] sm:$0xff] %vm144_vm0, %v2529_v48  ;;  %301 = vst.msk [vmem:[#allocation3 + $0x20] sm:$0xff] %vm144_vm0, %v2536_v52  ;;  %v342_v56 = vld [vmem:[#allocation2 + $0x99] sm:$0xff]  ;;  %v2555_v58 = vld [vmem:[#allocation2 + $0x50] sm:$0xff] }
  0x34   : > { %302 = vst.msk [vmem:[#allocation3 + $0x28] sm:$0xff] %vm144_vm0, %v2534_v51  ;;  %298 = vst.msk [vmem:[#allocation3 + $0x8] sm:$0xff] %vm144_vm0, %v266_v54  ;;  %v345_v59 = vld [vmem:[#allocation2 + $0xc1] sm:$0xff]  ;;  %v2561_v60 = vld [vmem:[#allocation2 + $0x78] sm:$0xff] }
  0x35   : > { %407 = vrot.lane.b32.xlu1 %v2498_v38, %s2315_s16  ;;  %413 = vrot.lane.b32.xlu0 %v339_v40, %s2315_s16  ;;  %303 = vst.msk [vmem:[#allocation3 + $0x30] sm:$0xff] %vm144_vm0, %v2545_v55  ;;  %305 = vst.msk [vmem:[#allocation3 + $0x40] sm:$0xff] %vm144_vm0, %v2553_v57  ;;  %v2563_v61 = vld [vmem:[#allocation2 + $0x68] sm:$0xff]  ;;  %v2565_v62 = vld [vmem:[#allocation2 + $0x90] sm:$0xff] }
  0x36   : > { %304 = vst.msk [vmem:[#allocation3 + $0x38] sm:$0xff] %vm144_vm0, %v2555_v58  ;;  %307 = vst.msk [vmem:[#allocation3 + $0x50] sm:$0xff] %vm144_vm0, %v2561_v60  ;;  %v2574_v63 = vld [vmem:[#allocation2 + $0x80] sm:$0xff]  ;;  %v279_v0 = vld [vmem:[#allocation2 + $0xa8] sm:$0xff] }
  0x37   : > { %306 = vst.msk [vmem:[#allocation3 + $0x48] sm:$0xff] %vm144_vm0, %v2563_v61  ;;  %309 = vst.msk [vmem:[#allocation3 + $0x60] sm:$0xff] %vm144_vm0, %v2565_v62  ;;  %v2576_v1 = vld [vmem:[#allocation2 + $0x98] sm:$0xff]  ;;  %v281_v2 = vld [vmem:[#allocation2 + $0xc0] sm:$0xff] }
  0x38   : > { %308 = vst.msk [vmem:[#allocation3 + $0x58] sm:$0xff] %vm144_vm0, %v2574_v63  ;;  %311 = vst.msk [vmem:[#allocation3 + $0x70] sm:$0xff] %vm144_vm0, %v279_v0  ;;  %v280_v3 = vld [vmem:[#allocation2 + $0xb0] sm:$0xff]  ;;  %v282_v4 = vld [vmem:[#allocation2 + $0xc8] sm:$0xff] }
  0x39   : > { %411 = vrot.lane.b32.xlu1 %v2508_v41, %s2315_s16  ;;  %417 = vrot.lane.b32.xlu0 %v341_v46, %s2315_s16  ;;  %310 = vst.msk [vmem:[#allocation3 + $0x68] sm:$0xff] %vm144_vm0, %v2576_v1  ;;  %313 = vst.msk [vmem:[#allocation3 + $0x80] sm:$0xff] %vm144_vm0, %v281_v2  ;;  %v2587_v5 = vld [vmem:[#allocation2 + $0x108] sm:$0xff]  ;;  %v344_v6 = vld [vmem:[#allocation2 + $0xb1] sm:$0xff] }
  0x3a   : > { %312 = vst.msk [vmem:[#allocation3 + $0x78] sm:$0xff] %vm144_vm0, %v280_v3  ;;  %314 = vst.msk [vmem:[#allocation3 + $0x88] sm:$0xff] %vm144_vm0, %v282_v4  ;;  %v2592_v7 = vld [vmem:[#allocation2 + $0xd9] sm:$0xff]  ;;  %v346_v9 = vld [vmem:[#allocation2 + $0xc9] sm:$0xff] }
  0x3b   : > { %319 = vst.msk [vmem:[#allocation3 + $0xb0] sm:$0xff] %vm144_vm0, %v2587_v5  ;;  %v2595_v8 = vld [vmem:[#allocation2 + $0x120] sm:$0xff]  ;;  %v2599_v10 = vld [vmem:[#allocation2 + $0x110] sm:$0xff]  ;;  %v2608_v12 = vld [vmem:[#allocation2 + $0x138] sm:$0xff] }
  0x3c   : > { %321 = vst.msk [vmem:[#allocation3 + $0xc0] sm:$0xff] %vm144_vm0, %v2595_v8  ;;  %320 = vst.msk [vmem:[#allocation3 + $0xb8] sm:$0xff] %vm144_vm0, %v2599_v10  ;;  %v2605_v11 = vld [vmem:[#allocation2 + $0xf1] sm:$0xff]  ;;  %v2610_v13 = vld [vmem:[#allocation2 + $0xe1] sm:$0xff] }
  0x3d   : > { %415 = vrot.lane.b32.xlu1 %v340_v47, %s2315_s16  ;;  %421 = vrot.lane.b32.xlu0 %v343_v53, %s2315_s16  ;;  %323 = vst.msk [vmem:[#allocation3 + $0xd0] sm:$0xff] %vm144_vm0, %v2608_v12  ;;  %v2614_v14 = vld [vmem:[#allocation2 + $0x128] sm:$0xff]  ;;  %v2624_v16 = vld [vmem:[#allocation2 + $0x150] sm:$0xff]  ;;  %v2626_v17 = vld [vmem:[#allocation2 + $0xf9] sm:$0xff] }
  0x3e   : > { %322 = vst.msk [vmem:[#allocation3 + $0xc8] sm:$0xff] %vm144_vm0, %v2614_v14  ;;  %v2620_v15 = vld [vmem:[#allocation2 + $0x109] sm:$0xff]  ;;  %325 = vst.msk [vmem:[#allocation3 + $0xe0] sm:$0xff] %vm144_vm0, %v2624_v16  ;;  %v2630_v18 = vld [vmem:[#allocation2 + $0x140] sm:$0xff] }
  0x3f   : > { %324 = vst.msk [vmem:[#allocation3 + $0xd8] sm:$0xff] %vm144_vm0, %v2630_v18  ;;  %v2636_v19 = vld [vmem:[#allocation2 + $0x121] sm:$0xff]  ;;  %v2642_v21 = vld [vmem:[#allocation2 + $0x111] sm:$0xff]  ;;  %v2652_v23 = vld [vmem:[#allocation2 + $0x139] sm:$0xff] }
  0x40   : > { %v2640_v20 = vld [vmem:[#allocation2 + $0x168] sm:$0xff]  ;;  %v2646_v22 = vld [vmem:[#allocation2 + $0x158] sm:$0xff]  ;;  %v2658_v28 = vld [vmem:[#allocation2 + $0x170] sm:$0xff] }
  0x41   : > { %419 = vrot.lane.b32.xlu1 %v342_v56, %s2315_s16  ;;  %425 = vrot.lane.b32.xlu0 %v345_v59, %s2315_s16  ;;  %327 = vst.msk [vmem:[#allocation3 + $0xf0] sm:$0xff] %vm144_vm0, %v2640_v20  ;;  %326 = vst.msk [vmem:[#allocation3 + $0xe8] sm:$0xff] %vm144_vm0, %v2646_v22  ;;  %v2656_v24 = vld [vmem:[#allocation2 + $0x129] sm:$0xff]  ;;  %v357_v29 = vld [vmem:[#allocation2 + $0x151] sm:$0xff] }
  0x42   : > { %328 = vst.msk [vmem:[#allocation3 + $0xf8] sm:$0xff] %vm144_vm0, %v2658_v28  ;;  %v2666_v33 = vld [vmem:[#allocation2 + $0x141] sm:$0xff]  ;;  %v359_v34 = vld [vmem:[#allocation2 + $0x169] sm:$0xff]  ;;  %v358_v35 = vld [vmem:[#allocation2 + $0x159] sm:$0xff] }
  0x43   : > { %v522_v36 = vld [vmem:[#allocation2 + $0x2] sm:$0xff]  ;;  %v360_v37 = vld [vmem:[#allocation2 + $0x171] sm:$0xff]  ;;  %v524_v39 = vld [vmem:[#allocation2 + $0x1a] sm:$0xff] }
  0x44   : > { %v523_v40 = vld [vmem:[#allocation2 + $0xa] sm:$0xff]  ;;  %v2676_v46 = vld [vmem:[#allocation2 + $0x32] sm:$0xff]  ;;  %v525_v47 = vld [vmem:[#allocation2 + $0x22] sm:$0xff] }
  0x45   : > { %423 = vrot.lane.b32.xlu1 %v344_v6, %s2315_s16  ;;  %429 = vrot.lane.b32.xlu0 %v2592_v7, %s2315_s16  ;;  %v2681_v50 = vld [vmem:[#allocation2 + $0x4a] sm:$0xff]  ;;  %v2684_v53 = vld [vmem:[#allocation2 + $0x3a] sm:$0xff]  ;;  %v2688_v54 = vld [vmem:[#allocation2 + $0x62] sm:$0xff] }
  0x46   : > { %v2692_v56 = vld [vmem:[#allocation2 + $0x52] sm:$0xff]  ;;  %v539_v59 = vld [vmem:[#allocation2 + $0xca] sm:$0xff]  ;;  %v538_v0 = vld [vmem:[#allocation2 + $0xc2] sm:$0xff] }
  0x47   : > { %v2739_v3 = vld [vmem:[#allocation2 + $0xfa] sm:$0xff]  ;;  %v2744_v6 = vld [vmem:[#allocation2 + $0xf2] sm:$0xff]  ;;  %vm2944_vm11 = vmpackc.low %vm1907_vm10, %vm1907_vm10 }
  0x49   : > { %427 = vrot.lane.b32.xlu1 %v346_v9, %s2315_s16  ;;  %433 = vrot.lane.b32.xlu0 %v2605_v11, %s2315_s16 }
  0x4d   : > { %431 = vrot.lane.b32.xlu1 %v2610_v13, %s2315_s16  ;;  %437 = vrot.lane.b32.xlu0 %v2620_v15, %s2315_s16 }
  0x51   : > { %435 = vrot.lane.b32.xlu1 %v2626_v17, %s2315_s16  ;;  %441 = vrot.lane.b32.xlu0 %v2636_v19, %s2315_s16 }
  0x55   : > { %439 = vrot.lane.b32.xlu1 %v2642_v21, %s2315_s16  ;;  %445 = vrot.lane.b32.xlu0 %v2652_v23, %s2315_s16 }
  0x59   : > { %443 = vrot.lane.b32.xlu1 %v2656_v24, %s2315_s16  ;;  %449 = vrot.lane.b32.xlu0 %v357_v29, %s2315_s16 }
  0x5d   : > { %447 = vrot.lane.b32.xlu1 %v2666_v33, %s2315_s16  ;;  %453 = vrot.lane.b32.xlu0 %v359_v34, %s2315_s16 }
  0x61   : > { %451 = vrot.lane.b32.xlu1 %v358_v35, %s2315_s16  ;;  %586 = vrot.lane.b32.xlu0 %v522_v36, %s2316_s17 }
  0x65   : > { %455 = vrot.lane.b32.xlu1 %v360_v37, %s2315_s16  ;;  %590 = vrot.lane.b32.xlu0 %v524_v39, %s2316_s17 }
  0x69   : > { %588 = vrot.lane.b32.xlu1 %v523_v40, %s2316_s17  ;;  %594 = vrot.lane.b32.xlu0 %v2676_v46, %s2316_s17 }
  0x6d   : > { %592 = vrot.lane.b32.xlu1 %v525_v47, %s2316_s17  ;;  %598 = vrot.lane.b32.xlu0 %v2681_v50, %s2316_s17 }
  0x71   : > { %596 = vrot.lane.b32.xlu1 %v2684_v53, %s2316_s17  ;;  %602 = vrot.lane.b32.xlu0 %v2688_v54, %s2316_s17 }
  0x75   : > { %600 = vrot.lane.b32.xlu1 %v2692_v56, %s2316_s17  ;;  %620 = vrot.lane.b32.xlu0 %v539_v59, %s2316_s17 }
  0x79   : > { %618 = vrot.lane.b32.xlu1 %v538_v0, %s2316_s17  ;;  %813 = vrot.lane.b32.xlu0 %v2510_v42, %s2317_s18  ;;  %v1118_v42 = vld [vmem:[#allocation2 + $0xe2] sm:$0xff] }
  0x7d   : > { %811 = vrot.lane.b32.xlu1 %v2512_v43, %s2317_s18  ;;  %781 = vrot.lane.b32.xlu0 %v2515_v44, %s2317_s18  ;;  %v1117_v43 = vld [vmem:[#allocation2 + $0xda] sm:$0xff] }
  0x81   : > { %779 = vrot.lane.b32.xlu1 %v2517_v45, %s2317_s18  ;;  %1006 = vrot.lane.b32.xlu0 %v2610_v13, %s2318_s19 }
  0x85   : > { %1004 = vrot.lane.b32.xlu1 %v2592_v7, %s2318_s19  ;;  %974 = vrot.lane.b32.xlu0 %v2470_v27, %s2318_s19  ;;  %v394_v27 = vpop.permute.xlu0 %393 }
  0x86   : > { %490 = vst.msk [vmem:[#allocation3] sm:$0xff] %vm489_vm2, %v394_v27  ;;  %v2819_v27 = vld [vmem:[#allocation2 + $0x112] sm:$0xff] }
  0x89   : > { %972 = vrot.lane.b32.xlu1 %v2461_v25, %s2318_s19  ;;  %1199 = vrot.lane.b32.xlu0 %v1118_v42, %s2319_s20 }
  0x8d   : > { %1197 = vrot.lane.b32.xlu1 %v1117_v43, %s2319_s20  ;;  %1167 = vrot.lane.b32.xlu0 %v525_v47, %s2319_s20 }
  0x91   : > { %1165 = vrot.lane.b32.xlu1 %v524_v39, %s2319_s20  ;;  %1393 = vrot.lane.b32.xlu0 %v2529_v48, %s2320_s21 }
  0x92   : > { %v396_v25 = vpop.permute.xlu0 %395 }
  0x93   : > { %491 = vst.msk [vmem:[#allocation3 + $0x8] sm:$0xff] %vm489_vm2, %v396_v25 }
  0x95   : > { %1391 = vrot.lane.b32.xlu1 %v2531_v49, %s2320_s21  ;;  %1361 = vrot.lane.b32.xlu0 %v2534_v51, %s2320_s21 }
  0x99   : > { %1359 = vrot.lane.b32.xlu1 %v2536_v52, %s2320_s21  ;;  %1586 = vrot.lane.b32.xlu0 %v2626_v17, %s2321_s22 }
  0x9b   : > { %v398_v44 = vpop.permute.xlu1 %397  ;;  %v402_v45 = vpop.permute.xlu0 %401 }
  0x9c   : > { %492 = vst.msk [vmem:[#allocation3 + $0x10] sm:$0xff] %vm489_vm2, %v398_v44  ;;  %494 = vst.msk [vmem:[#allocation3 + $0x20] sm:$0xff] %vm489_vm2, %v402_v45  ;;  %v2824_v44 = vld [vmem:[#allocation2 + $0x10a] sm:$0xff] }
  0x9d   : > { %1584 = vrot.lane.b32.xlu1 %v2605_v11, %s2321_s22  ;;  %1554 = vrot.lane.b32.xlu0 %v2482_v31, %s2321_s22 }
  0x9f   : > { %v400_v2 = vpop.permute.xlu1 %399  ;;  %v406_v4 = vpop.permute.xlu0 %405 }
  0xa0   : > { %493 = vst.msk [vmem:[#allocation3 + $0x18] sm:$0xff] %vm489_vm2, %v400_v2  ;;  %496 = vst.msk [vmem:[#allocation3 + $0x30] sm:$0xff] %vm489_vm2, %v406_v4 }
  0xa1   : > { %1552 = vrot.lane.b32.xlu1 %v2463_v26, %s2321_s22  ;;  %1779 = vrot.lane.b32.xlu0 %v2739_v3, %s2322_s23 }
  0xa3   : > { %v404_v7 = vpop.permute.xlu1 %403  ;;  %v410_v9 = vpop.permute.xlu0 %409 }
  0xa4   : > { %495 = vst.msk [vmem:[#allocation3 + $0x28] sm:$0xff] %vm489_vm2, %v404_v7  ;;  %498 = vst.msk [vmem:[#allocation3 + $0x40] sm:$0xff] %vm489_vm2, %v410_v9 }
  0xa5   : > { %1777 = vrot.lane.b32.xlu1 %v2744_v6, %s2322_s23  ;;  %1747 = vrot.lane.b32.xlu0 %v2684_v53, %s2322_s23 }
  0xa7   : > { %v408_v13 = vpop.permute.xlu1 %407  ;;  %v414_v29 = vpop.permute.xlu0 %413 }
  0xa8   : > { %497 = vst.msk [vmem:[#allocation3 + $0x38] sm:$0xff] %vm489_vm2, %v408_v13  ;;  %500 = vst.msk [vmem:[#allocation3 + $0x50] sm:$0xff] %vm489_vm2, %v414_v29 }
  0xa9   : > { %1745 = vrot.lane.b32.xlu1 %v2676_v46, %s2322_s23  ;;  %624 = vrot.lane.b32.xlu0 %v1118_v42, %s2316_s17 }
  0xab   : > { %v412_v34 = vpop.permute.xlu1 %411  ;;  %v418_v35 = vpop.permute.xlu0 %417 }
  0xac   : > { %499 = vst.msk [vmem:[#allocation3 + $0x48] sm:$0xff] %vm489_vm2, %v412_v34  ;;  %502 = vst.msk [vmem:[#allocation3 + $0x60] sm:$0xff] %vm489_vm2, %v418_v35 }
  0xad   : > { %622 = vrot.lane.b32.xlu1 %v1117_v43, %s2316_s17  ;;  %817 = vrot.lane.b32.xlu0 %v2529_v48, %s2317_s18 }
  0xaf   : > { %v416_v36 = vpop.permute.xlu1 %415  ;;  %v422_v37 = vpop.permute.xlu0 %421 }
  0xb0   : > { %501 = vst.msk [vmem:[#allocation3 + $0x58] sm:$0xff] %vm489_vm2, %v416_v36  ;;  %504 = vst.msk [vmem:[#allocation3 + $0x70] sm:$0xff] %vm489_vm2, %v422_v37 }
  0xb1   : > { %815 = vrot.lane.b32.xlu1 %v2531_v49, %s2317_s18  ;;  %785 = vrot.lane.b32.xlu0 %v2534_v51, %s2317_s18 }
  0xb3   : > { %v420_v39 = vpop.permute.xlu1 %419  ;;  %v426_v40 = vpop.permute.xlu0 %425 }
  0xb4   : > { %503 = vst.msk [vmem:[#allocation3 + $0x68] sm:$0xff] %vm489_vm2, %v420_v39  ;;  %506 = vst.msk [vmem:[#allocation3 + $0x80] sm:$0xff] %vm489_vm2, %v426_v40 }
  0xb5   : > { %783 = vrot.lane.b32.xlu1 %v2536_v52, %s2317_s18  ;;  %1010 = vrot.lane.b32.xlu0 %v2626_v17, %s2318_s19 }
  0xb7   : > { %v424_v48 = vpop.permute.xlu1 %423  ;;  %v430_v49 = vpop.permute.xlu0 %429 }
  0xb8   : > { %505 = vst.msk [vmem:[#allocation3 + $0x78] sm:$0xff] %vm489_vm2, %v424_v48  ;;  %508 = vst.msk [vmem:[#allocation3 + $0x90] sm:$0xff] %vm489_vm2, %v430_v49  ;;  %v2901_v48 = vld [vmem:[#allocation2 + $0x12a] sm:$0xff] }
  0xb9   : > { %1008 = vrot.lane.b32.xlu1 %v2605_v11, %s2318_s19  ;;  %978 = vrot.lane.b32.xlu0 %v2482_v31, %s2318_s19 }
  0xbb   : > { %v428_v51 = vpop.permute.xlu1 %427  ;;  %v434_v52 = vpop.permute.xlu0 %433 }
  0xbc   : > { %507 = vst.msk [vmem:[#allocation3 + $0x88] sm:$0xff] %vm489_vm2, %v428_v51  ;;  %510 = vst.msk [vmem:[#allocation3 + $0xa0] sm:$0xff] %vm489_vm2, %v434_v52  ;;  %v2906_v51 = vld [vmem:[#allocation2 + $0x122] sm:$0xff] }
  0xbd   : > { %976 = vrot.lane.b32.xlu1 %v2463_v26, %s2318_s19  ;;  %1203 = vrot.lane.b32.xlu0 %v2739_v3, %s2319_s20 }
  0xbf   : > { %v432_v17 = vpop.permute.xlu1 %431  ;;  %v438_v11 = vpop.permute.xlu0 %437 }
  0xc0   : > { %509 = vst.msk [vmem:[#allocation3 + $0x98] sm:$0xff] %vm489_vm2, %v432_v17  ;;  %512 = vst.msk [vmem:[#allocation3 + $0xb0] sm:$0xff] %vm489_vm2, %v438_v11  ;;  %v2911_v17 = vld [vmem:[#allocation2 + $0x6a] sm:$0xff] }
  0xc1   : > { %1201 = vrot.lane.b32.xlu1 %v2744_v6, %s2319_s20  ;;  %1171 = vrot.lane.b32.xlu0 %v2684_v53, %s2319_s20 }
  0xc3   : > { %v436_v31 = vpop.permute.xlu1 %435  ;;  %v442_v26 = vpop.permute.xlu0 %441 }
  0xc4   : > { %511 = vst.msk [vmem:[#allocation3 + $0xa8] sm:$0xff] %vm489_vm2, %v436_v31  ;;  %514 = vst.msk [vmem:[#allocation3 + $0xc0] sm:$0xff] %vm489_vm2, %v442_v26 }
  0xc5   : > { %1169 = vrot.lane.b32.xlu1 %v2676_v46, %s2319_s20  ;;  %1397 = vrot.lane.b32.xlu0 %v2599_v10, %s2320_s21 }
  0xc7   : > { %v440_v47 = vpop.permute.xlu1 %439  ;;  %v446_v59 = vpop.permute.xlu0 %445 }
  0xc8   : > { %513 = vst.msk [vmem:[#allocation3 + $0xb8] sm:$0xff] %vm489_vm2, %v440_v47  ;;  %516 = vst.msk [vmem:[#allocation3 + $0xd0] sm:$0xff] %vm489_vm2, %v446_v59 }
  0xc9   : > { %1395 = vrot.lane.b32.xlu1 %v2587_v5, %s2320_s21  ;;  %1365 = vrot.lane.b32.xlu0 %v2555_v58, %s2320_s21 }
  0xcb   : > { %v444_v53 = vpop.permute.xlu1 %443  ;;  %v450_v46 = vpop.permute.xlu0 %449 }
  0xcc   : > { %515 = vst.msk [vmem:[#allocation3 + $0xc8] sm:$0xff] %vm489_vm2, %v444_v53  ;;  %518 = vst.msk [vmem:[#allocation3 + $0xe0] sm:$0xff] %vm489_vm2, %v450_v46 }
  0xcd   : > { %1363 = vrot.lane.b32.xlu1 %v2545_v55, %s2320_s21  ;;  %1590 = vrot.lane.b32.xlu0 %v2642_v21, %s2321_s22 }
  0xcf   : > { %v448_v0 = vpop.permute.xlu1 %447  ;;  %v454_v42 = vpop.permute.xlu0 %453 }
  0xd0   : > { %517 = vst.msk [vmem:[#allocation3 + $0xd8] sm:$0xff] %vm489_vm2, %v448_v0  ;;  %520 = vst.msk [vmem:[#allocation3 + $0xf0] sm:$0xff] %vm489_vm2, %v454_v42 }
  0xd1   : > { %1588 = vrot.lane.b32.xlu1 %v2620_v15, %s2321_s22  ;;  %1558 = vrot.lane.b32.xlu0 %v2498_v38, %s2321_s22 }
  0xd3   : > { %v452_v43 = vpop.permute.xlu1 %451  ;;  %v587_v25 = vpop.permute.xlu0 %586 }
  0xd4   : > { %519 = vst.msk [vmem:[#allocation3 + $0xe8] sm:$0xff] %vm489_vm2, %v452_v43 }
  0xd5   : > { %1556 = vrot.lane.b32.xlu1 %v2478_v30, %s2321_s22  ;;  %683 = vst.msk [vmem:[#allocation3] sm:$0xff] %vm682_vm3, %v587_v25  ;;  %1783 = vrot.lane.b32.xlu0 %v2819_v27, %s2322_s23 }
  0xd7   : > { %v456_v45 = vpop.permute.xlu1 %455  ;;  %v591_v2 = vpop.permute.xlu0 %590 }
  0xd8   : > { %521 = vst.msk [vmem:[#allocation3 + $0xf8] sm:$0xff] %vm489_vm2, %v456_v45 }
  0xd9   : > { %1781 = vrot.lane.b32.xlu1 %v2824_v44, %s2322_s23  ;;  %685 = vst.msk [vmem:[#allocation3 + $0x10] sm:$0xff] %vm682_vm3, %v591_v2  ;;  %1751 = vrot.lane.b32.xlu0 %v2692_v56, %s2322_s23 }
  0xdb   : > { %v589_v4 = vpop.permute.xlu1 %588  ;;  %v595_v7 = vpop.permute.xlu0 %594 }
  0xdc   : > { %684 = vst.msk [vmem:[#allocation3 + $0x8] sm:$0xff] %vm682_vm3, %v589_v4  ;;  %687 = vst.msk [vmem:[#allocation3 + $0x20] sm:$0xff] %vm682_vm3, %v595_v7 }
  0xdd   : > { %1749 = vrot.lane.b32.xlu1 %v2681_v50, %s2322_s23  ;;  %628 = vrot.lane.b32.xlu0 %v2739_v3, %s2316_s17 }
  0xdf   : > { %v593_v9 = vpop.permute.xlu1 %592  ;;  %v599_v13 = vpop.permute.xlu0 %598 }
  0xe0   : > { %686 = vst.msk [vmem:[#allocation3 + $0x18] sm:$0xff] %vm682_vm3, %v593_v9  ;;  %689 = vst.msk [vmem:[#allocation3 + $0x30] sm:$0xff] %vm682_vm3, %v599_v13 }
  0xe1   : > { %626 = vrot.lane.b32.xlu1 %v2744_v6, %s2316_s17  ;;  %821 = vrot.lane.b32.xlu0 %v2599_v10, %s2317_s18 }
  0xe3   : > { %v597_v29 = vpop.permute.xlu1 %596  ;;  %v603_v34 = vpop.permute.xlu0 %602 }
  0xe4   : > { %688 = vst.msk [vmem:[#allocation3 + $0x28] sm:$0xff] %vm682_vm3, %v597_v29  ;;  %691 = vst.msk [vmem:[#allocation3 + $0x40] sm:$0xff] %vm682_vm3, %v603_v34 }
  0xe5   : > { %819 = vrot.lane.b32.xlu1 %v2587_v5, %s2317_s18  ;;  %789 = vrot.lane.b32.xlu0 %v2555_v58, %s2317_s18 }
  0xe7   : > { %v601_v3 = vpop.permute.xlu1 %600  ;;  %v621_v6 = vpop.permute.xlu0 %620 }
  0xe8   : > { %690 = vst.msk [vmem:[#allocation3 + $0x38] sm:$0xff] %vm682_vm3, %v601_v3  ;;  %700 = vst.msk [vmem:[#allocation3 + $0x88] sm:$0xff] %vm682_vm3, %v621_v6  ;;  %v2988_v3 = vld [vmem:[#allocation2 + $0x81] sm:$0xff] }
  0xe9   : > { %787 = vrot.lane.b32.xlu1 %v2545_v55, %s2317_s18  ;;  %1014 = vrot.lane.b32.xlu0 %v2642_v21, %s2318_s19 }
  0xeb   : > { %v619_v10 = vpop.permute.xlu1 %618  ;;  %v814_v5 = vpop.permute.xlu0 %813 }
  0xec   : > { %699 = vst.msk [vmem:[#allocation3 + $0x80] sm:$0xff] %vm682_vm3, %v619_v10  ;;  %v1494_v10 = vld [vmem:[#allocation2 + $0x79] sm:$0xff] }
  0xed   : > { %1012 = vrot.lane.b32.xlu1 %v2620_v15, %s2318_s19  ;;  %893 = vst.msk [vmem:[#allocation3 + $0x88] sm:$0xff] %vm875_vm4, %v814_v5  ;;  %982 = vrot.lane.b32.xlu0 %v2498_v38, %s2318_s19 }
  0xef   : > { %v812_v58 = vpop.permute.xlu1 %811  ;;  %v782_v55 = vpop.permute.xlu0 %781 }
  0xf0   : > { %892 = vst.msk [vmem:[#allocation3 + $0x80] sm:$0xff] %vm875_vm4, %v812_v58  ;;  %877 = vst.msk [vmem:[#allocation3 + $0x8] sm:$0xff] %vm875_vm4, %v782_v55  ;;  %v2996_v58 = vld [vmem:[#allocation2 + $0x142] sm:$0xff]  ;;  %v3000_v55 = vld [vmem:[#allocation2 + $0x13a] sm:$0xff] }
  0xf1   : > { %980 = vrot.lane.b32.xlu1 %v2478_v30, %s2318_s19  ;;  %1207 = vrot.lane.b32.xlu0 %v2819_v27, %s2319_s20 }
  0xf3   : > { %v780_v21 = vpop.permute.xlu1 %779  ;;  %v1007_v15 = vpop.permute.xlu0 %1006 }
  0xf4   : > { %876 = vst.msk [vmem:[#allocation3] sm:$0xff] %vm875_vm4, %v780_v21  ;;  %v3005_v21 = vld [vmem:[#allocation2 + $0x82] sm:$0xff] }
  0xf5   : > { %1205 = vrot.lane.b32.xlu1 %v2824_v44, %s2319_s20  ;;  %1086 = vst.msk [vmem:[#allocation3 + $0x88] sm:$0xff] %vm1068_vm5, %v1007_v15  ;;  %1175 = vrot.lane.b32.xlu0 %v2692_v56, %s2319_s20 }
  0xf7   : > { %v1005_v38 = vpop.permute.xlu1 %1004  ;;  %v975_v30 = vpop.permute.xlu0 %974 }
  0xf8   : > { %1085 = vst.msk [vmem:[#allocation3 + $0x80] sm:$0xff] %vm1068_vm5, %v1005_v38  ;;  %1070 = vst.msk [vmem:[#allocation3 + $0x8] sm:$0xff] %vm1068_vm5, %v975_v30  ;;  %v3010_v38 = vld [vmem:[#allocation2 + $0x7a] sm:$0xff] }
  0xf9   : > { %1173 = vrot.lane.b32.xlu1 %v2681_v50, %s2319_s20  ;;  %1401 = vrot.lane.b32.xlu0 %v2614_v14, %s2320_s21 }
  0xfb   : > { %v973_v35 = vpop.permute.xlu1 %972  ;;  %v1200_v36 = vpop.permute.xlu0 %1199 }
  0xfc   : > { %1069 = vst.msk [vmem:[#allocation3] sm:$0xff] %vm1068_vm5, %v973_v35 }
  0xfd   : > { %1399 = vrot.lane.b32.xlu1 %v2595_v8, %s2320_s21  ;;  %1279 = vst.msk [vmem:[#allocation3 + $0x88] sm:$0xff] %vm1261_vm6, %v1200_v36  ;;  %1369 = vrot.lane.b32.xlu0 %v2563_v61, %s2320_s21 }
  0xff   : > { %v1198_v56 = vpop.permute.xlu1 %1197  ;;  %v1168_v50 = vpop.permute.xlu0 %1167 }
 0x100   : > { %1278 = vst.msk [vmem:[#allocation3 + $0x80] sm:$0xff] %vm1261_vm6, %v1198_v56  ;;  %1263 = vst.msk [vmem:[#allocation3 + $0x8] sm:$0xff] %vm1261_vm6, %v1168_v50 }
 0x101   : > { %1367 = vrot.lane.b32.xlu1 %v2553_v57, %s2320_s21  ;;  %1594 = vrot.lane.b32.xlu0 %v2656_v24, %s2321_s22 }
 0x103   : > { %v1166_v37 = vpop.permute.xlu1 %1165  ;;  %v1394_v39 = vpop.permute.xlu0 %1393 }
 0x104   : > { %1262 = vst.msk [vmem:[#allocation3] sm:$0xff] %vm1261_vm6, %v1166_v37 }
 0x105   : > { %1592 = vrot.lane.b32.xlu1 %v2636_v19, %s2321_s22  ;;  %1473 = vst.msk [vmem:[#allocation3 + $0x88] sm:$0xff] %vm1455_vm7, %v1394_v39  ;;  %1562 = vrot.lane.b32.xlu0 %v2508_v41, %s2321_s22 }
 0x107   : > { %v1392_v40 = vpop.permute.xlu1 %1391  ;;  %v1362_v49 = vpop.permute.xlu0 %1361 }
 0x108   : > { %1472 = vst.msk [vmem:[#allocation3 + $0x80] sm:$0xff] %vm1455_vm7, %v1392_v40  ;;  %1457 = vst.msk [vmem:[#allocation3 + $0x8] sm:$0xff] %vm1455_vm7, %v1362_v49  ;;  %v932_v40 = vld [vmem:[#allocation2 + $0x139] sm:$0xff] }
 0x109   : > { %1560 = vrot.lane.b32.xlu1 %v2486_v32, %s2321_s22  ;;  %1787 = vrot.lane.b32.xlu0 %v2901_v48, %s2322_s23  ;;  %v231_v49 = vld [vmem:[%s2416_s15 + $0xf8] sm:$0xff] }
 0x10a   : > { %264 = vst.msk [vmem:[#allocation2 + $0x189] sm:$0xff] %vm144_vm0, %v231_v49  ;;  %v3171_v49 = vld [vmem:[#allocation2 + $0xa8] sm:$0xff] }
 0x10b   : > { %v1360_v52 = vpop.permute.xlu1 %1359  ;;  %v1587_v11 = vpop.permute.xlu0 %1586 }
 0x10c   : > { %1456 = vst.msk [vmem:[#allocation3] sm:$0xff] %vm1455_vm7, %v1360_v52 }
 0x10d   : > { %1785 = vrot.lane.b32.xlu1 %v2906_v51, %s2322_s23  ;;  %1666 = vst.msk [vmem:[#allocation3 + $0x88] sm:$0xff] %vm1648_vm8, %v1587_v11  ;;  %1755 = vrot.lane.b32.xlu0 %v2911_v17, %s2322_s23 }
 0x10f   : > { %v1585_v32 = vpop.permute.xlu1 %1584  ;;  %v1555_v31 = vpop.permute.xlu0 %1554 }
 0x110   : > { %1665 = vst.msk [vmem:[#allocation3 + $0x80] sm:$0xff] %vm1648_vm8, %v1585_v32  ;;  %1650 = vst.msk [vmem:[#allocation3 + $0x8] sm:$0xff] %vm1648_vm8, %v1555_v31  ;;  %v933_v32 = vld [vmem:[#allocation2 + $0x141] sm:$0xff] }
 0x111   : > { %1753 = vrot.lane.b32.xlu1 %v2688_v54, %s2322_s23  ;;  %632 = vrot.lane.b32.xlu0 %v2819_v27, %s2316_s17 }
 0x113   : > { %v1553_v26 = vpop.permute.xlu1 %1552  ;;  %v1780_v47 = vpop.permute.xlu0 %1779 }
 0x114   : > { %1649 = vst.msk [vmem:[#allocation3] sm:$0xff] %vm1648_vm8, %v1553_v26 }
 0x115   : > { %630 = vrot.lane.b32.xlu1 %v2824_v44, %s2316_s17  ;;  %1859 = vst.msk [vmem:[#allocation3 + $0x88] sm:$0xff] %vm1841_vm9, %v1780_v47  ;;  %825 = vrot.lane.b32.xlu0 %v2614_v14, %s2317_s18 }
 0x117   : > { %v1778_v59 = vpop.permute.xlu1 %1777  ;;  %v1748_v53 = vpop.permute.xlu0 %1747 }
 0x118   : > { %1858 = vst.msk [vmem:[#allocation3 + $0x80] sm:$0xff] %vm1841_vm9, %v1778_v59  ;;  %1843 = vst.msk [vmem:[#allocation3 + $0x8] sm:$0xff] %vm1841_vm9, %v1748_v53 }
 0x119   : > { %823 = vrot.lane.b32.xlu1 %v2595_v8, %s2317_s18  ;;  %793 = vrot.lane.b32.xlu0 %v2563_v61, %s2317_s18 }
 0x11b   : > { %v1746_v46 = vpop.permute.xlu1 %1745  ;;  %v625_v0 = vpop.permute.xlu0 %624 }
 0x11c   : > { %1842 = vst.msk [vmem:[#allocation3] sm:$0xff] %vm1841_vm9, %v1746_v46  ;;  %v1892_v14 = vld [vmem:[#allocation3 + $0x88] sm:$0xff] }
 0x11d   : > { %791 = vrot.lane.b32.xlu1 %v2553_v57, %s2317_s18  ;;  %702 = vst.msk [vmem:[#allocation3 + $0x98] sm:$0xff] %vm682_vm3, %v625_v0  ;;  %1018 = vrot.lane.b32.xlu0 %v2656_v24, %s2318_s19  ;;  %v914_v24 = vld [vmem:[#allocation2 + $0x61] sm:$0xff] }
 0x11f   : > { %v623_v42 = vpop.permute.xlu1 %622  ;;  %v1891_v8 = vld [vmem:[#allocation3 + $0x80] sm:$0xff]  ;;  %v818_v57 = vpop.permute.xlu0 %817  ;;  %v1876_v27 = vld [vmem:[#allocation3 + $0x8] sm:$0xff] }
 0x120   : > { %701 = vst.msk [vmem:[#allocation3 + $0x90] sm:$0xff] %vm682_vm3, %v623_v42  ;;  %v2239_v61 = vpack.c.bf16 %v1892_v14, %v1891_v8 }
 0x121   : > { %1016 = vrot.lane.b32.xlu1 %v2636_v19, %s2318_s19  ;;  %895 = vst.msk [vmem:[#allocation3 + $0x98] sm:$0xff] %vm875_vm4, %v818_v57  ;;  %986 = vrot.lane.b32.xlu0 %v2508_v41, %s2318_s19 }
 0x122   : > { %2241 = vmatprep.subr.msk.bf16.mxu0 %vm2944_vm11, %v2239_v61  ;;  %v3074_v61 = vld [vmem:[#allocation2 + $0x151] sm:$0xff] }
 0x123   : > { %v816_v25 = vpop.permute.xlu1 %815  ;;  %v1875_v44 = vld [vmem:[#allocation3] sm:$0xff]  ;;  %v786_v2 = vpop.permute.xlu0 %785 }
 0x124   : > { %894 = vst.msk [vmem:[#allocation3 + $0x90] sm:$0xff] %vm875_vm4, %v816_v25  ;;  %v2242_v45 = vpack.c.bf16 %v1876_v27, %v1875_v44  ;;  %879 = vst.msk [vmem:[#allocation3 + $0x18] sm:$0xff] %vm875_vm4, %v786_v2  ;;  %v3087_v25 = vld [vmem:[#allocation2 + $0x159] sm:$0xff] }
 0x125   : > { %984 = vrot.lane.b32.xlu1 %v914_v24, %s2318_s19  ;;  %1211 = vrot.lane.b32.xlu0 %v2901_v48, %s2319_s20  ;;  %v3082_v24 = vld [vmem:[#allocation2 + $0x91] sm:$0xff] }
 0x126   : > { %2244 = vmatpush3.bf16.xpose.msk.msra.mxu0 %vm2944_vm11, %v2242_v45  ;;  %v3092_v45 = vld [vmem:[#allocation2 + $0x152] sm:$0xff] }
 0x127   : > { %v784_v19 = vpop.permute.xlu1 %783  ;;  %v1011_v41 = vpop.permute.xlu0 %1010 }
 0x128   : > { %878 = vst.msk [vmem:[#allocation3 + $0x10] sm:$0xff] %vm875_vm4, %v784_v19  ;;  %v3097_v19 = vld [vmem:[#allocation2 + $0x99] sm:$0xff] }
 0x129   : > { %1209 = vrot.lane.b32.xlu1 %v2906_v51, %s2319_s20  ;;  %1088 = vst.msk [vmem:[#allocation3 + $0x98] sm:$0xff] %vm1068_vm5, %v1011_v41  ;;  %1179 = vrot.lane.b32.xlu0 %v2911_v17, %s2319_s20 }
 0x12b   : > { %v1009_v4 = vpop.permute.xlu1 %1008  ;;  %v979_v7 = vpop.permute.xlu0 %978 }
 0x12c   : > { %1087 = vst.msk [vmem:[#allocation3 + $0x90] sm:$0xff] %vm1068_vm5, %v1009_v4  ;;  %1072 = vst.msk [vmem:[#allocation3 + $0x18] sm:$0xff] %vm1068_vm5, %v979_v7  ;;  %v3102_v4 = vld [vmem:[#allocation2 + $0x92] sm:$0xff] }
 0x12d   : > { %1177 = vrot.lane.b32.xlu1 %v2688_v54, %s2319_s20  ;;  %1405 = vrot.lane.b32.xlu0 %v2630_v18, %s2320_s21 }
 0x12f   : > { %v977_v9 = vpop.permute.xlu1 %976  ;;  %v1204_v13 = vpop.permute.xlu0 %1203 }
 0x130   : > { %1071 = vst.msk [vmem:[#allocation3 + $0x10] sm:$0xff] %vm1068_vm5, %v977_v9  ;;  %v3107_v9 = vld [vmem:[#allocation2 + $0x15a] sm:$0xff] }
 0x131   : > { %1403 = vrot.lane.b32.xlu1 %v2608_v12, %s2320_s21  ;;  %1281 = vst.msk [vmem:[#allocation3 + $0x98] sm:$0xff] %vm1261_vm6, %v1204_v13  ;;  %1373 = vrot.lane.b32.xlu0 %v2574_v63, %s2320_s21 }
 0x133   : > { %v1202_v29 = vpop.permute.xlu1 %1201  ;;  %v1172_v54 = vpop.permute.xlu0 %1171 }
 0x134   : > { %1280 = vst.msk [vmem:[#allocation3 + $0x90] sm:$0xff] %vm1261_vm6, %v1202_v29  ;;  %1265 = vst.msk [vmem:[#allocation3 + $0x18] sm:$0xff] %vm1261_vm6, %v1172_v54  ;;  %v3115_v54 = vld [vmem:[#allocation2 + $0x9a] sm:$0xff] }
 0x135   : > { %1371 = vrot.lane.b32.xlu1 %v2561_v60, %s2320_s21  ;;  %1598 = vrot.lane.b32.xlu0 %v2666_v33, %s2321_s22 }
 0x137   : > { %v1170_v34 = vpop.permute.xlu1 %1169  ;;  %v1398_v6 = vpop.permute.xlu0 %1397 }
 0x138   : > { %1264 = vst.msk [vmem:[#allocation3 + $0x10] sm:$0xff] %vm1261_vm6, %v1170_v34 }
 0x139   : > { %1596 = vrot.lane.b32.xlu1 %v2652_v23, %s2321_s22  ;;  %1475 = vst.msk [vmem:[#allocation3 + $0x98] sm:$0xff] %vm1455_vm7, %v1398_v6  ;;  %1566 = vrot.lane.b32.xlu0 %v2988_v3, %s2321_s22 }
 0x13b   : > { %v1396_v5 = vpop.permute.xlu1 %1395  ;;  %v1366_v33 = vpop.permute.xlu0 %1365 }
 0x13c   : > { %1474 = vst.msk [vmem:[#allocation3 + $0x90] sm:$0xff] %vm1455_vm7, %v1396_v5  ;;  %1459 = vst.msk [vmem:[#allocation3 + $0x18] sm:$0xff] %vm1455_vm7, %v1366_v33  ;;  %v725_v33 = vld [vmem:[#allocation2 + $0x90] sm:$0xff] }
 0x13d   : > { %1564 = vrot.lane.b32.xlu1 %v1494_v10, %s2321_s22  ;;  %1791 = vrot.lane.b32.xlu0 %v2996_v58, %s2322_s23 }
 0x13f   : > { %v1364_v23 = vpop.permute.xlu1 %1363  ;;  %v1591_v15 = vpop.permute.xlu0 %1590 }
 0x140   : > { %1458 = vst.msk [vmem:[#allocation3 + $0x10] sm:$0xff] %vm1455_vm7, %v1364_v23 }
 0x141   : > { %1789 = vrot.lane.b32.xlu1 %v3000_v55, %s2322_s23  ;;  %1668 = vst.msk [vmem:[#allocation3 + $0x98] sm:$0xff] %vm1648_vm8, %v1591_v15  ;;  %1759 = vrot.lane.b32.xlu0 %v3005_v21, %s2322_s23 }
 0x143   : > { %v1589_v30 = vpop.permute.xlu1 %1588  ;;  %v1559_v35 = vpop.permute.xlu0 %1558 }
 0x144   : > { %1667 = vst.msk [vmem:[#allocation3 + $0x90] sm:$0xff] %vm1648_vm8, %v1589_v30  ;;  %1652 = vst.msk [vmem:[#allocation3 + $0x18] sm:$0xff] %vm1648_vm8, %v1559_v35 }
 0x145   : > { %1757 = vrot.lane.b32.xlu1 %v3010_v38, %s2322_s23  ;;  %636 = vrot.lane.b32.xlu0 %v2901_v48, %s2316_s17  ;;  %v230_v48 = vld [vmem:[%s2416_s15 + $0xf0] sm:$0xff] }
 0x146   : > { %263 = vst.msk [vmem:[#allocation2 + $0x181] sm:$0xff] %vm144_vm0, %v230_v48 }
 0x147   : > { %v1557_v36 = vpop.permute.xlu1 %1556  ;;  %v1784_v56 = vpop.permute.xlu0 %1783 }
 0x148   : > { %1651 = vst.msk [vmem:[#allocation3 + $0x10] sm:$0xff] %vm1648_vm8, %v1557_v36 }
 0x149   : > { %634 = vrot.lane.b32.xlu1 %v2906_v51, %s2316_s17  ;;  %1861 = vst.msk [vmem:[#allocation3 + $0x98] sm:$0xff] %vm1841_vm9, %v1784_v56  ;;  %827 = vrot.lane.b32.xlu0 %v2608_v12, %s2317_s18 }
 0x14b   : > { %v1782_v50 = vpop.permute.xlu1 %1781  ;;  %v1752_v37 = vpop.permute.xlu0 %1751 }
 0x14c   : > { %1860 = vst.msk [vmem:[#allocation3 + $0x90] sm:$0xff] %vm1841_vm9, %v1782_v50  ;;  %1845 = vst.msk [vmem:[#allocation3 + $0x18] sm:$0xff] %vm1841_vm9, %v1752_v37 }
 0x14d   : > { %604 = vrot.lane.b32.xlu1 %v2911_v17, %s2316_s17  ;;  %795 = vrot.lane.b32.xlu0 %v2561_v60, %s2317_s18 }
 0x14f   : > { %v1750_v39 = vpop.permute.xlu1 %1749  ;;  %v629_v12 = vpop.permute.xlu0 %628 }
 0x150   : > { %1844 = vst.msk [vmem:[#allocation3 + $0x10] sm:$0xff] %vm1841_vm9, %v1750_v39  ;;  %v1894_v51 = vld [vmem:[#allocation3 + $0x98] sm:$0xff] }
 0x151   : > { %829 = vrot.lane.b32.xlu1 %v2630_v18, %s2317_s18  ;;  %704 = vst.msk [vmem:[#allocation3 + $0xa8] sm:$0xff] %vm682_vm3, %v629_v12  ;;  %1020 = vrot.lane.b32.xlu0 %v932_v40, %s2318_s19 }
 0x153   : > { %v627_v52 = vpop.permute.xlu1 %626  ;;  %v1893_v17 = vld [vmem:[#allocation3 + $0x90] sm:$0xff]  ;;  %v822_v11 = vpop.permute.xlu0 %821  ;;  %v1878_v18 = vld [vmem:[#allocation3 + $0x18] sm:$0xff] }
 0x154   : > { %703 = vst.msk [vmem:[#allocation3 + $0xa0] sm:$0xff] %vm682_vm3, %v627_v52  ;;  %v2245_v60 = vpack.c.bf16 %v1894_v51, %v1893_v17  ;;  %v3179_v52 = vld [vmem:[#allocation2 + $0x169] sm:$0xff] }
 0x155   : > { %797 = vrot.lane.b32.xlu1 %v2574_v63, %s2317_s18  ;;  %897 = vst.msk [vmem:[#allocation3 + $0xa8] sm:$0xff] %vm875_vm4, %v822_v11  ;;  %988 = vrot.lane.b32.xlu0 %v1494_v10, %s2318_s19  ;;  %v3184_v17 = vld [vmem:[#allocation2 + $0xb0] sm:$0xff] }
 0x156   : > { %2247 = vmatprep.subr.msk.bf16.mxu0 %vm2944_vm11, %v2245_v60  ;;  %v3189_v11 = vld [vmem:[#allocation2 + $0xa9] sm:$0xff] }
 0x157   : > { %v820_v31 = vpop.permute.xlu1 %819  ;;  %v1877_v26 = vld [vmem:[#allocation3 + $0x10] sm:$0xff]  ;;  %v790_v59 = vpop.permute.xlu0 %789 }
 0x158   : > { %896 = vst.msk [vmem:[#allocation3 + $0xa0] sm:$0xff] %vm875_vm4, %v820_v31  ;;  %v2248_v47 = vpack.c.bf16 %v1878_v18, %v1877_v26  ;;  %881 = vst.msk [vmem:[#allocation3 + $0x28] sm:$0xff] %vm875_vm4, %v790_v59  ;;  %v3199_v26 = vld [vmem:[#allocation2 + $0x16a] sm:$0xff] }
 0x159   : > { %1022 = vrot.lane.b32.xlu1 %v933_v32, %s2318_s19  ;;  %1213 = vrot.lane.b32.xlu0 %v3000_v55, %s2319_s20  ;;  %v3194_v32 = vld [vmem:[#allocation2 + $0x171] sm:$0xff] }
 0x15a   : > { %2250 = vmatpush3.bf16.xpose.msk.msra.mxu0 %vm2944_vm11, %v2248_v47  ;;  %v3204_v59 = vld [vmem:[#allocation2 + $0xb1] sm:$0xff] }
 0x15b   : > { %v788_v63 = vpop.permute.xlu1 %787  ;;  %v1015_v53 = vpop.permute.xlu0 %1014 }
 0x15c   : > { %880 = vst.msk [vmem:[#allocation3 + $0x20] sm:$0xff] %vm875_vm4, %v788_v63 }
 0x15d   : > { %990 = vrot.lane.b32.xlu1 %v2988_v3, %s2318_s19  ;;  %1090 = vst.msk [vmem:[#allocation3 + $0xa8] sm:$0xff] %vm1068_vm5, %v1015_v53  ;;  %1181 = vrot.lane.b32.xlu0 %v3010_v38, %s2319_s20  ;;  %v3209_v53 = vld [vmem:[#allocation2 + $0xaa] sm:$0xff] }
 0x15f   : > { %v1013_v46 = vpop.permute.xlu1 %1012  ;;  %v983_v0 = vpop.permute.xlu0 %982 }
 0x160   : > { %1089 = vst.msk [vmem:[#allocation3 + $0xa0] sm:$0xff] %vm1068_vm5, %v1013_v46  ;;  %1074 = vst.msk [vmem:[#allocation3 + $0x28] sm:$0xff] %vm1068_vm5, %v983_v0  ;;  %v3214_v0 = vld [vmem:[#allocation2 + $0x172] sm:$0xff] }
 0x161   : > { %1215 = vrot.lane.b32.xlu1 %v2996_v58, %s2319_s20  ;;  %1407 = vrot.lane.b32.xlu0 %v2624_v16, %s2320_s21 }
 0x163   : > { %v981_v14 = vpop.permute.xlu1 %980  ;;  %v1208_v42 = vpop.permute.xlu0 %1207 }
 0x164   : > { %1073 = vst.msk [vmem:[#allocation3 + $0x20] sm:$0xff] %vm1068_vm5, %v981_v14 }
 0x165   : > { %1183 = vrot.lane.b32.xlu1 %v3005_v21, %s2319_s20  ;;  %1283 = vst.msk [vmem:[#allocation3 + $0xa8] sm:$0xff] %vm1261_vm6, %v1208_v42  ;;  %1375 = vrot.lane.b32.xlu0 %v2565_v62, %s2320_s21 }
 0x167   : > { %v1206_v8 = vpop.permute.xlu1 %1205  ;;  %v1176_v57 = vpop.permute.xlu0 %1175 }
 0x168   : > { %1282 = vst.msk [vmem:[#allocation3 + $0xa0] sm:$0xff] %vm1261_vm6, %v1206_v8  ;;  %1267 = vst.msk [vmem:[#allocation3 + $0x28] sm:$0xff] %vm1261_vm6, %v1176_v57  ;;  %v3222_v8 = vld [vmem:[#allocation2 + $0xb2] sm:$0xff] }
 0x169   : > { %1409 = vrot.lane.b32.xlu1 %v2646_v22, %s2320_s21  ;;  %1600 = vrot.lane.b32.xlu0 %v3074_v61, %s2321_s22 }
 0x16b   : > { %v1174_v27 = vpop.permute.xlu1 %1173  ;;  %v1402_v62 = vpop.permute.xlu0 %1401 }
 0x16c   : > { %1266 = vst.msk [vmem:[#allocation3 + $0x20] sm:$0xff] %vm1261_vm6, %v1174_v27 }
 0x16d   : > { %1377 = vrot.lane.b32.xlu1 %v2576_v1, %s2320_s21  ;;  %1477 = vst.msk [vmem:[#allocation3 + $0xa8] sm:$0xff] %vm1455_vm7, %v1402_v62  ;;  %1568 = vrot.lane.b32.xlu0 %v3082_v24, %s2321_s22 }
 0x16f   : > { %v1400_v44 = vpop.permute.xlu1 %1399  ;;  %v1370_v2 = vpop.permute.xlu0 %1369 }
 0x170   : > { %1476 = vst.msk [vmem:[#allocation3 + $0xa0] sm:$0xff] %vm1455_vm7, %v1400_v44  ;;  %1461 = vst.msk [vmem:[#allocation3 + $0x28] sm:$0xff] %vm1455_vm7, %v1370_v2 }
 0x171   : > { %1602 = vrot.lane.b32.xlu1 %v3087_v25, %s2321_s22  ;;  %1793 = vrot.lane.b32.xlu0 %v3092_v45, %s2322_s23 }
 0x173   : > { %v1368_v41 = vpop.permute.xlu1 %1367  ;;  %v1595_v7 = vpop.permute.xlu0 %1594 }
 0x174   : > { %1460 = vst.msk [vmem:[#allocation3 + $0x20] sm:$0xff] %vm1455_vm7, %v1368_v41 }
 0x175   : > { %1570 = vrot.lane.b32.xlu1 %v3097_v19, %s2321_s22  ;;  %1670 = vst.msk [vmem:[#allocation3 + $0xa8] sm:$0xff] %vm1648_vm8, %v1595_v7  ;;  %1761 = vrot.lane.b32.xlu0 %v3102_v4, %s2322_s23 }
 0x177   : > { %v1593_v13 = vpop.permute.xlu1 %1592  ;;  %v1563_v29 = vpop.permute.xlu0 %1562 }
 0x178   : > { %1669 = vst.msk [vmem:[#allocation3 + $0xa0] sm:$0xff] %vm1648_vm8, %v1593_v13  ;;  %1654 = vst.msk [vmem:[#allocation3 + $0x28] sm:$0xff] %vm1648_vm8, %v1563_v29 }
 0x179   : > { %1795 = vrot.lane.b32.xlu1 %v3107_v9, %s2322_s23  ;;  %638 = vrot.lane.b32.xlu0 %v3000_v55, %s2316_s17 }
 0x17b   : > { %v1561_v34 = vpop.permute.xlu1 %1560  ;;  %v1788_v3 = vpop.permute.xlu0 %1787 }
 0x17c   : > { %1653 = vst.msk [vmem:[#allocation3 + $0x20] sm:$0xff] %vm1648_vm8, %v1561_v34 }
 0x17d   : > { %1763 = vrot.lane.b32.xlu1 %v3115_v54, %s2322_s23  ;;  %1863 = vst.msk [vmem:[#allocation3 + $0xa8] sm:$0xff] %vm1841_vm9, %v1788_v3  ;;  %606 = vrot.lane.b32.xlu0 %v3010_v38, %s2316_s17 }
 0x17f   : > { %v1786_v6 = vpop.permute.xlu1 %1785  ;;  %v1756_v10 = vpop.permute.xlu0 %1755 }
 0x180   : > { %1862 = vst.msk [vmem:[#allocation3 + $0xa0] sm:$0xff] %vm1841_vm9, %v1786_v6  ;;  %1847 = vst.msk [vmem:[#allocation3 + $0x28] sm:$0xff] %vm1841_vm9, %v1756_v10 }
 0x181   : > { %640 = vrot.lane.b32.xlu1 %v2996_v58, %s2316_s17  ;;  %831 = vrot.lane.b32.xlu0 %v2624_v16, %s2317_s18 }
 0x183   : > { %v1754_v5 = vpop.permute.xlu1 %1753  ;;  %v633_v55 = vpop.permute.xlu0 %632 }
 0x184   : > { %1846 = vst.msk [vmem:[#allocation3 + $0x20] sm:$0xff] %vm1841_vm9, %v1754_v5  ;;  %v1896_v23 = vld [vmem:[#allocation3 + $0xa8] sm:$0xff]  ;;  %v3272_v5 = vld [vmem:[#allocation2 + $0x180] sm:$0xff] }
 0x185   : > { %608 = vrot.lane.b32.xlu1 %v3005_v21, %s2316_s17  ;;  %706 = vst.msk [vmem:[#allocation3 + $0xb8] sm:$0xff] %vm682_vm3, %v633_v55  ;;  %799 = vrot.lane.b32.xlu0 %v725_v33, %s2317_s18 }
 0x187   : > { %v631_v15 = vpop.permute.xlu1 %630  ;;  %v1895_v38 = vld [vmem:[#allocation3 + $0xa0] sm:$0xff]  ;;  %v826_v16 = vpop.permute.xlu0 %825  ;;  %v1880_v30 = vld [vmem:[#allocation3 + $0x28] sm:$0xff] }
 0x188   : > { %705 = vst.msk [vmem:[#allocation3 + $0xb0] sm:$0xff] %vm682_vm3, %v631_v15  ;;  %v2251_v58 = vpack.c.bf16 %v1896_v23, %v1895_v38  ;;  %v3280_v23 = vld [vmem:[#allocation2 + $0xc0] sm:$0xff]  ;;  %v3284_v38 = vld [vmem:[#allocation2 + $0x188] sm:$0xff] }
 0x189   : > { %833 = vrot.lane.b32.xlu1 %v2646_v22, %s2317_s18  ;;  %899 = vst.msk [vmem:[#allocation3 + $0xb8] sm:$0xff] %vm875_vm4, %v826_v16  ;;  %1024 = vrot.lane.b32.xlu0 %v3074_v61, %s2318_s19  ;;  %v3290_v16 = vld [vmem:[#allocation2 + $0x181] sm:$0xff] }
 0x18a   : > { %2253 = vmatprep.subr.msk.bf16.mxu0 %vm2944_vm11, %v2251_v58 }
 0x18b   : > { %v824_v21 = vpop.permute.xlu1 %823  ;;  %v1879_v35 = vld [vmem:[#allocation3 + $0x20] sm:$0xff]  ;;  %v794_v56 = vpop.permute.xlu0 %793 }
 0x18c   : > { %898 = vst.msk [vmem:[#allocation3 + $0xb0] sm:$0xff] %vm875_vm4, %v824_v21  ;;  %v2254_v36 = vpack.c.bf16 %v1880_v30, %v1879_v35  ;;  %883 = vst.msk [vmem:[#allocation3 + $0x38] sm:$0xff] %vm875_vm4, %v794_v56  ;;  %v3294_v21 = vld [vmem:[#allocation2 + $0xc8] sm:$0xff] }
 0x18d   : > { %801 = vrot.lane.b32.xlu1 %v2576_v1, %s2317_s18  ;;  %992 = vrot.lane.b32.xlu0 %v3082_v24, %s2318_s19  ;;  %v743_v24 = vld [vmem:[#allocation2 + $0x168] sm:$0xff] }
 0x18e   : > { %2256 = vmatpush3.bf16.xpose.msk.msra.mxu0 %vm2944_vm11, %v2254_v36  ;;  %v3300_v36 = vld [vmem:[#allocation2 + $0xc1] sm:$0xff] }
 0x18f   : > { %v792_v22 = vpop.permute.xlu1 %791  ;;  %v1019_v50 = vpop.permute.xlu0 %1018 }
 0x190   : > { %882 = vst.msk [vmem:[#allocation3 + $0x30] sm:$0xff] %vm875_vm4, %v792_v22  ;;  %v3304_v22 = vld [vmem:[#allocation2 + $0x189] sm:$0xff] }
 0x191   : > { %1026 = vrot.lane.b32.xlu1 %v3087_v25, %s2318_s19  ;;  %1092 = vst.msk [vmem:[#allocation3 + $0xb8] sm:$0xff] %vm1068_vm5, %v1019_v50  ;;  %1217 = vrot.lane.b32.xlu0 %v3092_v45, %s2319_s20 }
 0x193   : > { %v1017_v37 = vpop.permute.xlu1 %1016  ;;  %v987_v1 = vpop.permute.xlu0 %986 }
 0x194   : > { %1091 = vst.msk [vmem:[#allocation3 + $0xb0] sm:$0xff] %vm1068_vm5, %v1017_v37  ;;  %1076 = vst.msk [vmem:[#allocation3 + $0x38] sm:$0xff] %vm1068_vm5, %v987_v1  ;;  %v3310_v37 = vld [vmem:[#allocation2 + $0x182] sm:$0xff] }
 0x195   : > { %994 = vrot.lane.b32.xlu1 %v3097_v19, %s2318_s19  ;;  %1185 = vrot.lane.b32.xlu0 %v3102_v4, %s2319_s20 }
 0x197   : > { %v985_v39 = vpop.permute.xlu1 %984  ;;  %v1212_v40 = vpop.permute.xlu0 %1211 }
 0x198   : > { %1075 = vst.msk [vmem:[#allocation3 + $0x30] sm:$0xff] %vm1068_vm5, %v985_v39  ;;  %v3314_v39 = vld [vmem:[#allocation2 + $0xc9] sm:$0xff] }
 0x199   : > { %1219 = vrot.lane.b32.xlu1 %v3107_v9, %s2319_s20  ;;  %1285 = vst.msk [vmem:[#allocation3 + $0xb8] sm:$0xff] %vm1261_vm6, %v1212_v40  ;;  %1411 = vrot.lane.b32.xlu0 %v2640_v20, %s2320_s21 }
 0x19b   : > { %v1210_v48 = vpop.permute.xlu1 %1209  ;;  %v1180_v12 = vpop.permute.xlu0 %1179 }
 0x19c   : > { %1284 = vst.msk [vmem:[#allocation3 + $0xb0] sm:$0xff] %vm1261_vm6, %v1210_v48  ;;  %1269 = vst.msk [vmem:[#allocation3 + $0x38] sm:$0xff] %vm1261_vm6, %v1180_v12  ;;  %v1693_v48 = vld [vmem:[#allocation2 + $0xc2] sm:$0xff]  ;;  %v1710_v12 = vld [vmem:[#allocation2 + $0x18a] sm:$0xff] }
 0x19d   : > { %1187 = vrot.lane.b32.xlu1 %v3115_v54, %s2319_s20  ;;  %1379 = vrot.lane.b32.xlu0 %v3171_v49, %s2320_s21 }
 0x19f   : > { %v1178_v51 = vpop.permute.xlu1 %1177  ;;  %v1406_v20 = vpop.permute.xlu0 %1405 }
 0x1a0   : > { %1268 = vst.msk [vmem:[#allocation3 + $0x30] sm:$0xff] %vm1261_vm6, %v1178_v51 }
 0x1a1   : > { %1413 = vrot.lane.b32.xlu1 %v2658_v28, %s2320_s21  ;;  %1479 = vst.msk [vmem:[#allocation3 + $0xb8] sm:$0xff] %vm1455_vm7, %v1406_v20  ;;  %1604 = vrot.lane.b32.xlu0 %v3179_v52, %s2321_s22  ;;  %v1694_v20 = vld [vmem:[#allocation2 + $0xca] sm:$0xff] }
 0x1a3   : > { %v1404_v60 = vpop.permute.xlu1 %1403  ;;  %v1374_v18 = vpop.permute.xlu0 %1373 }
 0x1a4   : > { %1478 = vst.msk [vmem:[#allocation3 + $0xb0] sm:$0xff] %vm1455_vm7, %v1404_v60  ;;  %1463 = vst.msk [vmem:[#allocation3 + $0x38] sm:$0xff] %vm1455_vm7, %v1374_v18 }
 0x1a5   : > { %1381 = vrot.lane.b32.xlu1 %v3184_v17, %s2320_s21  ;;  %1572 = vrot.lane.b32.xlu0 %v3189_v11, %s2321_s22 }
 0x1a7   : > { %v1372_v31 = vpop.permute.xlu1 %1371  ;;  %v1599_v47 = vpop.permute.xlu0 %1598 }
 0x1a8   : > { %1462 = vst.msk [vmem:[#allocation3 + $0x30] sm:$0xff] %vm1455_vm7, %v1372_v31 }
 0x1a9   : > { %1606 = vrot.lane.b32.xlu1 %v3194_v32, %s2321_s22  ;;  %1672 = vst.msk [vmem:[#allocation3 + $0xb8] sm:$0xff] %vm1648_vm8, %v1599_v47  ;;  %1797 = vrot.lane.b32.xlu0 %v3199_v26, %s2322_s23 }
 0x1ab   : > { %v1597_v63 = vpop.permute.xlu1 %1596  ;;  %v1567_v46 = vpop.permute.xlu0 %1566 }
 0x1ac   : > { %1671 = vst.msk [vmem:[#allocation3 + $0xb0] sm:$0xff] %vm1648_vm8, %v1597_v63  ;;  %1656 = vst.msk [vmem:[#allocation3 + $0x38] sm:$0xff] %vm1648_vm8, %v1567_v46 }
 0x1ad   : > { %1574 = vrot.lane.b32.xlu1 %v3204_v59, %s2321_s22  ;;  %1765 = vrot.lane.b32.xlu0 %v3209_v53, %s2322_s23 }
 0x1af   : > { %v1565_v14 = vpop.permute.xlu1 %1564  ;;  %v1792_v42 = vpop.permute.xlu0 %1791 }
 0x1b0   : > { %1655 = vst.msk [vmem:[#allocation3 + $0x30] sm:$0xff] %vm1648_vm8, %v1565_v14 }
 0x1b1   : > { %1799 = vrot.lane.b32.xlu1 %v3214_v0, %s2322_s23  ;;  %1865 = vst.msk [vmem:[#allocation3 + $0xb8] sm:$0xff] %vm1841_vm9, %v1792_v42  ;;  %642 = vrot.lane.b32.xlu0 %v3092_v45, %s2316_s17 }
 0x1b3   : > { %v1790_v61 = vpop.permute.xlu1 %1789  ;;  %v1760_v57 = vpop.permute.xlu0 %1759 }
 0x1b4   : > { %1864 = vst.msk [vmem:[#allocation3 + $0xb0] sm:$0xff] %vm1841_vm9, %v1790_v61  ;;  %1849 = vst.msk [vmem:[#allocation3 + $0x38] sm:$0xff] %vm1841_vm9, %v1760_v57 }
 0x1b5   : > { %1767 = vrot.lane.b32.xlu1 %v3222_v8, %s2322_s23  ;;  %610 = vrot.lane.b32.xlu0 %v3102_v4, %s2316_s17 }
 0x1b7   : > { %v1758_v27 = vpop.permute.xlu1 %1757  ;;  %v637_v25 = vpop.permute.xlu0 %636 }
 0x1b8   : > { %1848 = vst.msk [vmem:[#allocation3 + $0x30] sm:$0xff] %vm1841_vm9, %v1758_v27  ;;  %v1898_v62 = vld [vmem:[#allocation3 + $0xb8] sm:$0xff] }
 0x1b9   : > { %644 = vrot.lane.b32.xlu1 %v3107_v9, %s2316_s17  ;;  %708 = vst.msk [vmem:[#allocation3 + $0xc8] sm:$0xff] %vm682_vm3, %v637_v25  ;;  %835 = vrot.lane.b32.xlu0 %v743_v24, %s2317_s18  ;;  %v1325_v25 = vld [vmem:[#allocation2 + $0x198] sm:$0xff] }
 0x1bb   : > { %v635_v44 = vpop.permute.xlu1 %634  ;;  %v1897_v45 = vld [vmem:[#allocation3 + $0xb0] sm:$0xff]  ;;  %v1882_v19 = vld [vmem:[#allocation3 + $0x38] sm:$0xff]  ;;  %v828_v41 = vpop.permute.xlu0 %827 }
 0x1bc   : > { %707 = vst.msk [vmem:[#allocation3 + $0xc0] sm:$0xff] %vm682_vm3, %v635_v44  ;;  %v2257_v2 = vpack.c.bf16 %v1898_v62, %v1897_v45 }
 0x1bd   : > { %612 = vrot.lane.b32.xlu1 %v3115_v54, %s2316_s17  ;;  %900 = vst.msk [vmem:[#allocation3 + $0xc0] sm:$0xff] %vm875_vm4, %v828_v41  ;;  %803 = vrot.lane.b32.xlu0 %v3171_v49, %s2317_s18  ;;  %v1326_v41 = vld [vmem:[#allocation2 + $0x1a0] sm:$0xff] }
 0x1be   : > { %2259 = vmatprep.subr.msk.bf16.mxu0 %vm2944_vm11, %v2257_v2  ;;  %v1309_v2 = vld [vmem:[#allocation2 + $0xd8] sm:$0xff] }
 0x1bf   : > { %v605_v4 = vpop.permute.xlu1 %604  ;;  %v1881_v7 = vld [vmem:[#allocation3 + $0x30] sm:$0xff]  ;;  %v796_v13 = vpop.permute.xlu0 %795 }
 0x1c0   : > { %692 = vst.msk [vmem:[#allocation3 + $0x48] sm:$0xff] %vm682_vm3, %v605_v4  ;;  %v2260_v9 = vpack.c.bf16 %v1882_v19, %v1881_v7  ;;  %v1518_v7 = vld [vmem:[#allocation2 + $0x199] sm:$0xff] }
 0x1c1   : > { %837 = vrot.lane.b32.xlu1 %v2658_v28, %s2317_s18  ;;  %884 = vst.msk [vmem:[#allocation3 + $0x40] sm:$0xff] %vm875_vm4, %v796_v13  ;;  %1028 = vrot.lane.b32.xlu0 %v3179_v52, %s2318_s19  ;;  %v1310_v13 = vld [vmem:[#allocation2 + $0xe0] sm:$0xff] }
 0x1c2   : > { %2262 = vmatpush3.bf16.xpose.msk.msra.mxu0 %vm2944_vm11, %v2260_v9 }
 0x1c3   : > { %v830_v29 = vpop.permute.xlu1 %829  ;;  %v1021_v54 = vpop.permute.xlu0 %1020 }
 0x1c4   : > { %901 = vst.msk [vmem:[#allocation3 + $0xc8] sm:$0xff] %vm875_vm4, %v830_v29 }
 0x1c5   : > { %805 = vrot.lane.b32.xlu1 %v3184_v17, %s2317_s18  ;;  %1093 = vst.msk [vmem:[#allocation3 + $0xc0] sm:$0xff] %vm1068_vm5, %v1021_v54  ;;  %996 = vrot.lane.b32.xlu0 %v3189_v11, %s2318_s19  ;;  %v1502_v54 = vld [vmem:[#allocation2 + $0xd9] sm:$0xff] }
 0x1c7   : > { %v798_v34 = vpop.permute.xlu1 %797  ;;  %v989_v28 = vpop.permute.xlu0 %988 }
 0x1c8   : > { %885 = vst.msk [vmem:[#allocation3 + $0x48] sm:$0xff] %vm875_vm4, %v798_v34 }
 0x1c9   : > { %1030 = vrot.lane.b32.xlu1 %v3194_v32, %s2318_s19  ;;  %1077 = vst.msk [vmem:[#allocation3 + $0x40] sm:$0xff] %vm1068_vm5, %v989_v28  ;;  %1221 = vrot.lane.b32.xlu0 %v3199_v26, %s2319_s20  ;;  %v1519_v28 = vld [vmem:[#allocation2 + $0x1a1] sm:$0xff] }
 0x1cb   : > { %v1023_v3 = vpop.permute.xlu1 %1022  ;;  %v1214_v6 = vpop.permute.xlu0 %1213 }
 0x1cc   : > { %1094 = vst.msk [vmem:[#allocation3 + $0xc8] sm:$0xff] %vm1068_vm5, %v1023_v3 }
 0x1cd   : > { %998 = vrot.lane.b32.xlu1 %v3204_v59, %s2318_s19  ;;  %1286 = vst.msk [vmem:[#allocation3 + $0xc0] sm:$0xff] %vm1261_vm6, %v1214_v6  ;;  %1189 = vrot.lane.b32.xlu0 %v3209_v53, %s2319_s20  ;;  %v1711_v6 = vld [vmem:[#allocation2 + $0x19a] sm:$0xff] }
 0x1cf   : > { %v991_v10 = vpop.permute.xlu1 %990  ;;  %v1182_v33 = vpop.permute.xlu0 %1181 }
 0x1d0   : > { %1078 = vst.msk [vmem:[#allocation3 + $0x48] sm:$0xff] %vm1068_vm5, %v991_v10 }
 0x1d1   : > { %1223 = vrot.lane.b32.xlu1 %v3214_v0, %s2319_s20  ;;  %1270 = vst.msk [vmem:[#allocation3 + $0x40] sm:$0xff] %vm1261_vm6, %v1182_v33  ;;  %1415 = vrot.lane.b32.xlu0 %v3272_v5, %s2320_s21 }
 0x1d3   : > { %v1216_v55 = vpop.permute.xlu1 %1215  ;;  %v1408_v15 = vpop.permute.xlu0 %1407 }
 0x1d4   : > { %1287 = vst.msk [vmem:[#allocation3 + $0xc8] sm:$0xff] %vm1261_vm6, %v1216_v55  ;;  %v1695_v55 = vld [vmem:[#allocation2 + $0xda] sm:$0xff] }
 0x1d5   : > { %1191 = vrot.lane.b32.xlu1 %v3222_v8, %s2319_s20  ;;  %1480 = vst.msk [vmem:[#allocation3 + $0xc0] sm:$0xff] %vm1455_vm7, %v1408_v15  ;;  %1383 = vrot.lane.b32.xlu0 %v3280_v23, %s2320_s21  ;;  %v1712_v15 = vld [vmem:[#allocation2 + $0x1a2] sm:$0xff] }
 0x1d7   : > { %v1184_v58 = vpop.permute.xlu1 %1183  ;;  %v1376_v30 = vpop.permute.xlu0 %1375 }
 0x1d8   : > { %1271 = vst.msk [vmem:[#allocation3 + $0x48] sm:$0xff] %vm1261_vm6, %v1184_v58 }
 0x1d9   : > { %1417 = vrot.lane.b32.xlu1 %v3284_v38, %s2320_s21  ;;  %1464 = vst.msk [vmem:[#allocation3 + $0x40] sm:$0xff] %vm1455_vm7, %v1376_v30  ;;  %1608 = vrot.lane.b32.xlu0 %v3290_v16, %s2321_s22  ;;  %v3403_v30 = vld [vmem:[%s3488_s1] sm:$0xff] }
 0x1da   : > { %2237 = vmatprep.mubr.msk.f32.mxu0 %vm1907_vm10, %v3403_v30 }
 0x1db   : > { %v1410_v35 = vpop.permute.xlu1 %1409  ;;  %v1601_v56 = vpop.permute.xlu0 %1600 }
 0x1dc   : > { %1481 = vst.msk [vmem:[#allocation3 + $0xc8] sm:$0xff] %vm1455_vm7, %v1410_v35 }
 0x1dd   : > { %1385 = vrot.lane.b32.xlu1 %v3294_v21, %s2320_s21  ;;  %1673 = vst.msk [vmem:[#allocation3 + $0xc0] sm:$0xff] %vm1648_vm8, %v1601_v56  ;;  %1576 = vrot.lane.b32.xlu0 %v3300_v36, %s2321_s22 }
 0x1df   : > { %v1378_v50 = vpop.permute.xlu1 %1377  ;;  %v1569_v1 = vpop.permute.xlu0 %1568 }
 0x1e0   : > { %1465 = vst.msk [vmem:[#allocation3 + $0x48] sm:$0xff] %vm1455_vm7, %v1378_v50 }
 0x1e1   : > { %1610 = vrot.lane.b32.xlu1 %v3304_v22, %s2321_s22  ;;  %1657 = vst.msk [vmem:[#allocation3 + $0x40] sm:$0xff] %vm1648_vm8, %v1569_v1  ;;  %1801 = vrot.lane.b32.xlu0 %v3310_v37, %s2322_s23 }
 0x1e3   : > { %v1603_v40 = vpop.permute.xlu1 %1602  ;;  %v1794_v49 = vpop.permute.xlu0 %1793 }
 0x1e4   : > { %1674 = vst.msk [vmem:[#allocation3 + $0xc8] sm:$0xff] %vm1648_vm8, %v1603_v40 }
 0x1e5   : > { %1578 = vrot.lane.b32.xlu1 %v3314_v39, %s2321_s22  ;;  %1866 = vst.msk [vmem:[#allocation3 + $0xc0] sm:$0xff] %vm1841_vm9, %v1794_v49  ;;  %1769 = vrot.lane.b32.xlu0 %v1693_v48, %s2322_s23 }
 0x1e7   : > { %v1571_v51 = vpop.permute.xlu1 %1570  ;;  %v1762_v52 = vpop.permute.xlu0 %1761 }
 0x1e8   : > { %1658 = vst.msk [vmem:[#allocation3 + $0x48] sm:$0xff] %vm1648_vm8, %v1571_v51 }
 0x1e9   : > { %1803 = vrot.lane.b32.xlu1 %v1710_v12, %s2322_s23  ;;  %1850 = vst.msk [vmem:[#allocation3 + $0x40] sm:$0xff] %vm1841_vm9, %v1762_v52  ;;  %646 = vrot.lane.b32.xlu0 %v3199_v26, %s2316_s17 }
 0x1eb   : > { %v1796_v17 = vpop.permute.xlu1 %1795  ;;  %v639_v60 = vpop.permute.xlu0 %638 }
 0x1ec   : > { %1867 = vst.msk [vmem:[#allocation3 + $0xc8] sm:$0xff] %vm1841_vm9, %v1796_v17  ;;  %v1899_v18 = vld [vmem:[#allocation3 + $0xc0] sm:$0xff] }
 0x1ed   : > { %1771 = vrot.lane.b32.xlu1 %v1694_v20, %s2322_s23  ;;  %709 = vst.msk [vmem:[#allocation3 + $0xd0] sm:$0xff] %vm682_vm3, %v639_v60  ;;  %614 = vrot.lane.b32.xlu0 %v3209_v53, %s2316_s17 }
 0x1ef   : > { %v1764_v11 = vpop.permute.xlu1 %1763  ;;  %v607_v32 = vpop.permute.xlu0 %606 }
 0x1f0   : > { %1851 = vst.msk [vmem:[#allocation3 + $0x48] sm:$0xff] %vm1841_vm9, %v1764_v11  ;;  %v1883_v59 = vld [vmem:[#allocation3 + $0x40] sm:$0xff] }
 0x1f1   : > { %648 = vrot.lane.b32.xlu1 %v3214_v0, %s2316_s17  ;;  %693 = vst.msk [vmem:[#allocation3 + $0x50] sm:$0xff] %vm682_vm3, %v607_v32  ;;  %839 = vrot.lane.b32.xlu0 %v3272_v5, %s2317_s18  ;;  %v1503_v5 = vld [vmem:[#allocation2 + $0xe1] sm:$0xff] }
 0x1f3   : > { %v641_v31 = vpop.permute.xlu1 %640  ;;  %v1900_v26 = vld [vmem:[#allocation3 + $0xc8] sm:$0xff]  ;;  %v832_v63 = vpop.permute.xlu0 %831 }
 0x1f4   : > { %710 = vst.msk [vmem:[#allocation3 + $0xd8] sm:$0xff] %vm682_vm3, %v641_v31  ;;  %v2263_v47 = vpack.c.bf16 %v1900_v26, %v1899_v18 }
 0x1f5   : > { %616 = vrot.lane.b32.xlu1 %v3222_v8, %s2316_s17  ;;  %902 = vst.msk [vmem:[#allocation3 + $0xd0] sm:$0xff] %vm875_vm4, %v832_v63  ;;  %807 = vrot.lane.b32.xlu0 %v3280_v23, %s2317_s18 }
 0x1f6   : > { %2265 = vmatprep.subr.msk.bf16.mxu0 %vm2944_vm11, %v2263_v47 }
 0x1f7   : > { %v609_v53 = vpop.permute.xlu1 %608  ;;  %v1884_v46 = vld [vmem:[#allocation3 + $0x48] sm:$0xff]  ;;  %v800_v14 = vpop.permute.xlu0 %799 }
 0x1f8   : > { %694 = vst.msk [vmem:[#allocation3 + $0x58] sm:$0xff] %vm682_vm3, %v609_v53  ;;  %v2266_v0 = vpack.c.bf16 %v1884_v46, %v1883_v59 }
 0x1f9   : > { %841 = vrot.lane.b32.xlu1 %v3284_v38, %s2317_s18  ;;  %886 = vst.msk [vmem:[#allocation3 + $0x50] sm:$0xff] %vm875_vm4, %v800_v14  ;;  %1032 = vrot.lane.b32.xlu0 %v3290_v16, %s2318_s19  ;;  %v1696_v16 = vld [vmem:[#allocation2 + $0xe2] sm:$0xff] }
 0x1fa   : > { %2268 = vmatpush3.bf16.xpose.msk.msra.mxu0 %vm2944_vm11, %v2266_v0 }
 0x1fb   : > { %v834_v42 = vpop.permute.xlu1 %833  ;;  %v1025_v8 = vpop.permute.xlu0 %1024 }
 0x1fc   : > { %903 = vst.msk [vmem:[#allocation3 + $0xd8] sm:$0xff] %vm875_vm4, %v834_v42 }
 0x1fd   : > { %809 = vrot.lane.b32.xlu1 %v3294_v21, %s2317_s18  ;;  %1095 = vst.msk [vmem:[#allocation3 + $0xd0] sm:$0xff] %vm1068_vm5, %v1025_v8  ;;  %1000 = vrot.lane.b32.xlu0 %v3300_v36, %s2318_s19 }
 0x1ff   : > { %v802_v61 = vpop.permute.xlu1 %801  ;;  %v993_v57 = vpop.permute.xlu0 %992 }
 0x200   : > { %887 = vst.msk [vmem:[#allocation3 + $0x58] sm:$0xff] %vm875_vm4, %v802_v61 }
 0x201   : > { %1034 = vrot.lane.b32.xlu1 %v3304_v22, %s2318_s19  ;;  %1079 = vst.msk [vmem:[#allocation3 + $0x50] sm:$0xff] %vm1068_vm5, %v993_v57  ;;  %1225 = vrot.lane.b32.xlu0 %v3310_v37, %s2319_s20 }
 0x203   : > { %v1027_v27 = vpop.permute.xlu1 %1026  ;;  %v1218_v24 = vpop.permute.xlu0 %1217 }
 0x204   : > { %1096 = vst.msk [vmem:[#allocation3 + $0xd8] sm:$0xff] %vm1068_vm5, %v1027_v27 }
 0x205   : > { %1002 = vrot.lane.b32.xlu1 %v3314_v39, %s2318_s19  ;;  %1288 = vst.msk [vmem:[#allocation3 + $0xd0] sm:$0xff] %vm1261_vm6, %v1218_v24  ;;  %1193 = vrot.lane.b32.xlu0 %v1693_v48, %s2319_s20 }
 0x207   : > { %v995_v62 = vpop.permute.xlu1 %994  ;;  %v1186_v44 = vpop.permute.xlu0 %1185 }
 0x208   : > { %1080 = vst.msk [vmem:[#allocation3 + $0x58] sm:$0xff] %vm1068_vm5, %v995_v62 }
 0x209   : > { %1227 = vrot.lane.b32.xlu1 %v1710_v12, %s2319_s20  ;;  %1272 = vst.msk [vmem:[#allocation3 + $0x50] sm:$0xff] %vm1261_vm6, %v1186_v44  ;;  %1419 = vrot.lane.b32.xlu0 %v1325_v25, %s2320_s21 }
 0x20b   : > { %v1220_v45 = vpop.permute.xlu1 %1219  ;;  %v1412_v19 = vpop.permute.xlu0 %1411 }
 0x20c   : > { %1289 = vst.msk [vmem:[#allocation3 + $0xd8] sm:$0xff] %vm1261_vm6, %v1220_v45 }
 0x20d   : > { %1195 = vrot.lane.b32.xlu1 %v1694_v20, %s2319_s20  ;;  %1482 = vst.msk [vmem:[#allocation3 + $0xd0] sm:$0xff] %vm1455_vm7, %v1412_v19  ;;  %1387 = vrot.lane.b32.xlu0 %v1309_v2, %s2320_s21 }
 0x20f   : > { %v1188_v4 = vpop.permute.xlu1 %1187  ;;  %v1380_v9 = vpop.permute.xlu0 %1379 }
 0x210   : > { %1273 = vst.msk [vmem:[#allocation3 + $0x58] sm:$0xff] %vm1261_vm6, %v1188_v4 }
 0x211   : > { %1421 = vrot.lane.b32.xlu1 %v1326_v41, %s2320_s21  ;;  %1466 = vst.msk [vmem:[#allocation3 + $0x50] sm:$0xff] %vm1455_vm7, %v1380_v9  ;;  %1612 = vrot.lane.b32.xlu0 %v1518_v7, %s2321_s22 }
 0x213   : > { %v1414_v29 = vpop.permute.xlu1 %1413  ;;  %v1605_v34 = vpop.permute.xlu0 %1604 }
 0x214   : > { %1483 = vst.msk [vmem:[#allocation3 + $0xd8] sm:$0xff] %vm1455_vm7, %v1414_v29 }
 0x215   : > { %1389 = vrot.lane.b32.xlu1 %v1310_v13, %s2320_s21  ;;  %1675 = vst.msk [vmem:[#allocation3 + $0xd0] sm:$0xff] %vm1648_vm8, %v1605_v34  ;;  %1580 = vrot.lane.b32.xlu0 %v1502_v54, %s2321_s22 }
 0x217   : > { %v1382_v3 = vpop.permute.xlu1 %1381  ;;  %v1573_v10 = vpop.permute.xlu0 %1572 }
 0x218   : > { %1467 = vst.msk [vmem:[#allocation3 + $0x58] sm:$0xff] %vm1455_vm7, %v1382_v3 }
 0x219   : > { %1614 = vrot.lane.b32.xlu1 %v1519_v28, %s2321_s22  ;;  %1659 = vst.msk [vmem:[#allocation3 + $0x50] sm:$0xff] %vm1648_vm8, %v1573_v10  ;;  %1805 = vrot.lane.b32.xlu0 %v1711_v6, %s2322_s23 }
 0x21b   : > { %v1607_v33 = vpop.permute.xlu1 %1606  ;;  %v1798_v23 = vpop.permute.xlu0 %1797 }
 0x21c   : > { %1676 = vst.msk [vmem:[#allocation3 + $0xd8] sm:$0xff] %vm1648_vm8, %v1607_v33 }
 0x21d   : > { %1582 = vrot.lane.b32.xlu1 %v1503_v5, %s2321_s22  ;;  %1868 = vst.msk [vmem:[#allocation3 + $0xd0] sm:$0xff] %vm1841_vm9, %v1798_v23  ;;  %1773 = vrot.lane.b32.xlu0 %v1695_v55, %s2322_s23 }
 0x21f   : > { %v1575_v38 = vpop.permute.xlu1 %1574  ;;  %v1766_v58 = vpop.permute.xlu0 %1765 }
 0x220   : > { %1660 = vst.msk [vmem:[#allocation3 + $0x58] sm:$0xff] %vm1648_vm8, %v1575_v38 }
 0x221   : > { %1807 = vrot.lane.b32.xlu1 %v1712_v15, %s2322_s23  ;;  %1852 = vst.msk [vmem:[#allocation3 + $0x50] sm:$0xff] %vm1841_vm9, %v1766_v58 }
 0x223   : > { %v1800_v21 = vpop.permute.xlu1 %1799  ;;  %v643_v35 = vpop.permute.xlu0 %642 }
 0x224   : > { %1869 = vst.msk [vmem:[#allocation3 + $0xd8] sm:$0xff] %vm1841_vm9, %v1800_v21  ;;  %v1901_v56 = vld [vmem:[#allocation3 + $0xd0] sm:$0xff] }
 0x225   : > { %1775 = vrot.lane.b32.xlu1 %v1696_v16, %s2322_s23  ;;  %711 = vst.msk [vmem:[#allocation3 + $0xe0] sm:$0xff] %vm682_vm3, %v643_v35 }
 0x227   : > { %v1768_v36 = vpop.permute.xlu1 %1767  ;;  %v611_v22 = vpop.permute.xlu0 %610 }
 0x228   : > { %1853 = vst.msk [vmem:[#allocation3 + $0x58] sm:$0xff] %vm1841_vm9, %v1768_v36  ;;  %v1885_v39 = vld [vmem:[#allocation3 + $0x50] sm:$0xff] }
 0x229   : > { %695 = vst.msk [vmem:[#allocation3 + $0x60] sm:$0xff] %vm682_vm3, %v611_v22 }
 0x22b   : > { %v645_v50 = vpop.permute.xlu1 %644  ;;  %v1902_v37 = vld [vmem:[#allocation3 + $0xd8] sm:$0xff]  ;;  %v836_v40 = vpop.permute.xlu0 %835 }
 0x22c   : > { %712 = vst.msk [vmem:[#allocation3 + $0xe8] sm:$0xff] %vm682_vm3, %v645_v50  ;;  %v2269_v1 = vpack.c.bf16 %v1902_v37, %v1901_v56 }
 0x22d   : > { %904 = vst.msk [vmem:[#allocation3 + $0xe0] sm:$0xff] %vm875_vm4, %v836_v40 }
 0x22e   : > { %2271 = vmatprep.subr.msk.bf16.mxu0 %vm2944_vm11, %v2269_v1 }
 0x22f   : > { %v613_v48 = vpop.permute.xlu1 %612  ;;  %v1886_v49 = vld [vmem:[#allocation3 + $0x58] sm:$0xff]  ;;  %v804_v51 = vpop.permute.xlu0 %803 }
 0x230   : > { %696 = vst.msk [vmem:[#allocation3 + $0x68] sm:$0xff] %vm682_vm3, %v613_v48  ;;  %v2272_v12 = vpack.c.bf16 %v1886_v49, %v1885_v39 }
 0x231   : > { %888 = vst.msk [vmem:[#allocation3 + $0x60] sm:$0xff] %vm875_vm4, %v804_v51 }
 0x232   : > { %2274 = vmatpush3.bf16.xpose.msk.msra.mxu0 %vm2944_vm11, %v2272_v12 }
 0x233   : > { %v838_v52 = vpop.permute.xlu1 %837  ;;  %v1029_v20 = vpop.permute.xlu0 %1028 }
 0x234   : > { %905 = vst.msk [vmem:[#allocation3 + $0xe8] sm:$0xff] %vm875_vm4, %v838_v52 }
 0x235   : > { %1097 = vst.msk [vmem:[#allocation3 + $0xe0] sm:$0xff] %vm1068_vm5, %v1029_v20 }
 0x237   : > { %v806_v17 = vpop.permute.xlu1 %805  ;;  %v997_v60 = vpop.permute.xlu0 %996 }
 0x238   : > { %889 = vst.msk [vmem:[#allocation3 + $0x68] sm:$0xff] %vm875_vm4, %v806_v17 }
 0x239   : > { %1081 = vst.msk [vmem:[#allocation3 + $0x60] sm:$0xff] %vm1068_vm5, %v997_v60 }
 0x23b   : > { %v1031_v11 = vpop.permute.xlu1 %1030  ;;  %v1222_v18 = vpop.permute.xlu0 %1221 }
 0x23c   : > { %1098 = vst.msk [vmem:[#allocation3 + $0xe8] sm:$0xff] %vm1068_vm5, %v1031_v11 }
 0x23d   : > { %1290 = vst.msk [vmem:[#allocation3 + $0xe0] sm:$0xff] %vm1261_vm6, %v1222_v18 }
 0x23f   : > { %v999_v32 = vpop.permute.xlu1 %998  ;;  %v1190_v31 = vpop.permute.xlu0 %1189 }
 0x240   : > { %1082 = vst.msk [vmem:[#allocation3 + $0x68] sm:$0xff] %vm1068_vm5, %v999_v32 }
 0x241   : > { %1274 = vst.msk [vmem:[#allocation3 + $0x60] sm:$0xff] %vm1261_vm6, %v1190_v31 }
 0x243   : > { %v1224_v26 = vpop.permute.xlu1 %1223  ;;  %v1416_v47 = vpop.permute.xlu0 %1415 }
 0x244   : > { %1291 = vst.msk [vmem:[#allocation3 + $0xe8] sm:$0xff] %vm1261_vm6, %v1224_v26 }
 0x245   : > { %1484 = vst.msk [vmem:[#allocation3 + $0xe0] sm:$0xff] %vm1455_vm7, %v1416_v47 }
 0x247   : > { %v1192_v59 = vpop.permute.xlu1 %1191  ;;  %v1384_v63 = vpop.permute.xlu0 %1383 }
 0x248   : > { %1275 = vst.msk [vmem:[#allocation3 + $0x68] sm:$0xff] %vm1261_vm6, %v1192_v59 }
 0x249   : > { %1468 = vst.msk [vmem:[#allocation3 + $0x60] sm:$0xff] %vm1455_vm7, %v1384_v63 }
 0x24b   : > { %v1418_v53 = vpop.permute.xlu1 %1417  ;;  %v1609_v46 = vpop.permute.xlu0 %1608 }
 0x24c   : > { %1485 = vst.msk [vmem:[#allocation3 + $0xe8] sm:$0xff] %vm1455_vm7, %v1418_v53 }
 0x24d   : > { %1677 = vst.msk [vmem:[#allocation3 + $0xe0] sm:$0xff] %vm1648_vm8, %v1609_v46 }
 0x24f   : > { %v1386_v0 = vpop.permute.xlu1 %1385  ;;  %v1577_v14 = vpop.permute.xlu0 %1576 }
 0x250   : > { %1469 = vst.msk [vmem:[#allocation3 + $0x68] sm:$0xff] %vm1455_vm7, %v1386_v0 }
 0x251   : > { %1661 = vst.msk [vmem:[#allocation3 + $0x60] sm:$0xff] %vm1648_vm8, %v1577_v14 }
 0x253   : > { %v1611_v42 = vpop.permute.xlu1 %1610  ;;  %v1802_v8 = vpop.permute.xlu0 %1801 }
 0x254   : > { %1678 = vst.msk [vmem:[#allocation3 + $0xe8] sm:$0xff] %vm1648_vm8, %v1611_v42 }
 0x255   : > { %1870 = vst.msk [vmem:[#allocation3 + $0xe0] sm:$0xff] %vm1841_vm9, %v1802_v8 }
 0x257   : > { %v1579_v61 = vpop.permute.xlu1 %1578  ;;  %v1770_v57 = vpop.permute.xlu0 %1769 }
 0x258   : > { %1662 = vst.msk [vmem:[#allocation3 + $0x68] sm:$0xff] %vm1648_vm8, %v1579_v61 }
 0x259   : > { %1854 = vst.msk [vmem:[#allocation3 + $0x60] sm:$0xff] %vm1841_vm9, %v1770_v57 }
 0x25b   : > { %v1804_v27 = vpop.permute.xlu1 %1803  ;;  %v647_v24 = vpop.permute.xlu0 %646 }
 0x25c   : > { %1871 = vst.msk [vmem:[#allocation3 + $0xe8] sm:$0xff] %vm1841_vm9, %v1804_v27  ;;  %v1903_v25 = vld [vmem:[#allocation3 + $0xe0] sm:$0xff] }
 0x25d   : > { %713 = vst.msk [vmem:[#allocation3 + $0xf0] sm:$0xff] %vm682_vm3, %v647_v24 }
 0x25f   : > { %v1772_v62 = vpop.permute.xlu1 %1771  ;;  %v615_v44 = vpop.permute.xlu0 %614 }
 0x260   : > { %1855 = vst.msk [vmem:[#allocation3 + $0x68] sm:$0xff] %vm1841_vm9, %v1772_v62  ;;  %v1887_v41 = vld [vmem:[#allocation3 + $0x60] sm:$0xff] }
 0x261   : > { %697 = vst.msk [vmem:[#allocation3 + $0x70] sm:$0xff] %vm682_vm3, %v615_v44 }
 0x263   : > { %v649_v45 = vpop.permute.xlu1 %648  ;;  %v1904_v2 = vld [vmem:[#allocation3 + $0xe8] sm:$0xff]  ;;  %v840_v4 = vpop.permute.xlu0 %839 }
 0x264   : > { %714 = vst.msk [vmem:[#allocation3 + $0xf8] sm:$0xff] %vm682_vm3, %v649_v45  ;;  %v2275_v19 = vpack.c.bf16 %v1904_v2, %v1903_v25 }
 0x265   : > { %906 = vst.msk [vmem:[#allocation3 + $0xf0] sm:$0xff] %vm875_vm4, %v840_v4 }
 0x266   : > { %2277 = vmatprep.subr.msk.bf16.mxu0 %vm2944_vm11, %v2275_v19 }
 0x267   : > { %v617_v7 = vpop.permute.xlu1 %616  ;;  %v1888_v9 = vld [vmem:[#allocation3 + $0x68] sm:$0xff]  ;;  %v808_v29 = vpop.permute.xlu0 %807 }
 0x268   : > { %698 = vst.msk [vmem:[#allocation3 + $0x78] sm:$0xff] %vm682_vm3, %v617_v7  ;;  %v2278_v13 = vpack.c.bf16 %v1888_v9, %v1887_v41 }
 0x269   : > { %890 = vst.msk [vmem:[#allocation3 + $0x70] sm:$0xff] %vm875_vm4, %v808_v29 }
 0x26a   : > { %2280 = vmatpush3.bf16.xpose.msk.msra.mxu0 %vm2944_vm11, %v2278_v13 }
 0x26b   : > { %v842_v54 = vpop.permute.xlu1 %841  ;;  %v1033_v34 = vpop.permute.xlu0 %1032 }
 0x26c   : > { %907 = vst.msk [vmem:[#allocation3 + $0xf8] sm:$0xff] %vm875_vm4, %v842_v54 }
 0x26d   : > { %1099 = vst.msk [vmem:[#allocation3 + $0xf0] sm:$0xff] %vm1068_vm5, %v1033_v34 }
 0x26f   : > { %v810_v28 = vpop.permute.xlu1 %809  ;;  %v1001_v3 = vpop.permute.xlu0 %1000 }
 0x270   : > { %891 = vst.msk [vmem:[#allocation3 + $0x78] sm:$0xff] %vm875_vm4, %v810_v28 }
 0x271   : > { %1083 = vst.msk [vmem:[#allocation3 + $0x70] sm:$0xff] %vm1068_vm5, %v1001_v3 }
 0x273   : > { %v1035_v6 = vpop.permute.xlu1 %1034  ;;  %v1226_v10 = vpop.permute.xlu0 %1225 }
 0x274   : > { %1100 = vst.msk [vmem:[#allocation3 + $0xf8] sm:$0xff] %vm1068_vm5, %v1035_v6 }
 0x275   : > { %1292 = vst.msk [vmem:[#allocation3 + $0xf0] sm:$0xff] %vm1261_vm6, %v1226_v10 }
 0x277   : > { %v1003_v5 = vpop.permute.xlu1 %1002  ;;  %v1194_v33 = vpop.permute.xlu0 %1193 }
 0x278   : > { %1084 = vst.msk [vmem:[#allocation3 + $0x78] sm:$0xff] %vm1068_vm5, %v1003_v5 }
 0x279   : > { %1276 = vst.msk [vmem:[#allocation3 + $0x70] sm:$0xff] %vm1261_vm6, %v1194_v33 }
 0x27b   : > { %v1228_v55 = vpop.permute.xlu1 %1227  ;;  %v1420_v23 = vpop.permute.xlu0 %1419 }
 0x27c   : > { %1293 = vst.msk [vmem:[#allocation3 + $0xf8] sm:$0xff] %vm1261_vm6, %v1228_v55 }
 0x27d   : > { %1486 = vst.msk [vmem:[#allocation3 + $0xf0] sm:$0xff] %vm1455_vm7, %v1420_v23 }
 0x27f   : > { %v1196_v15 = vpop.permute.xlu1 %1195  ;;  %v1388_v38 = vpop.permute.xlu0 %1387 }
 0x280   : > { %1277 = vst.msk [vmem:[#allocation3 + $0x78] sm:$0xff] %vm1261_vm6, %v1196_v15 }
 0x281   : > { %1470 = vst.msk [vmem:[#allocation3 + $0x70] sm:$0xff] %vm1455_vm7, %v1388_v38 }
 0x283   : > { %v1422_v58 = vpop.permute.xlu1 %1421  ;;  %v1613_v16 = vpop.permute.xlu0 %1612 }
 0x284   : > { %1487 = vst.msk [vmem:[#allocation3 + $0xf8] sm:$0xff] %vm1455_vm7, %v1422_v58 }
 0x285   : > { %1679 = vst.msk [vmem:[#allocation3 + $0xf0] sm:$0xff] %vm1648_vm8, %v1613_v16 }
 0x287   : > { %v1390_v21 = vpop.permute.xlu1 %1389  ;;  %v1581_v35 = vpop.permute.xlu0 %1580 }
 0x288   : > { %1471 = vst.msk [vmem:[#allocation3 + $0x78] sm:$0xff] %vm1455_vm7, %v1390_v21 }
 0x289   : > { %1663 = vst.msk [vmem:[#allocation3 + $0x70] sm:$0xff] %vm1648_vm8, %v1581_v35 }
 0x28b   : > { %v1615_v36 = vpop.permute.xlu1 %1614  ;;  %v1806_v56 = vpop.permute.xlu0 %1805 }
 0x28c   : > { %1680 = vst.msk [vmem:[#allocation3 + $0xf8] sm:$0xff] %vm1648_vm8, %v1615_v36 }
 0x28d   : > { %1872 = vst.msk [vmem:[#allocation3 + $0xf0] sm:$0xff] %vm1841_vm9, %v1806_v56 }
 0x28f   : > { %v1583_v22 = vpop.permute.xlu1 %1582  ;;  %v1774_v50 = vpop.permute.xlu0 %1773 }
 0x290   : > { %1664 = vst.msk [vmem:[#allocation3 + $0x78] sm:$0xff] %vm1648_vm8, %v1583_v22 }
 0x291   : > { %1856 = vst.msk [vmem:[#allocation3 + $0x70] sm:$0xff] %vm1841_vm9, %v1774_v50 }
 0x293   : > { %v1808_v37 = vpop.permute.xlu1 %1807 }
 0x294   : > { %1873 = vst.msk [vmem:[#allocation3 + $0xf8] sm:$0xff] %vm1841_vm9, %v1808_v37  ;;  %v1905_v39 = vld [vmem:[#allocation3 + $0xf0] sm:$0xff] }
 0x297   : > { %v1776_v1 = vpop.permute.xlu1 %1775 }
 0x298   : > { %1857 = vst.msk [vmem:[#allocation3 + $0x78] sm:$0xff] %vm1841_vm9, %v1776_v1  ;;  %v1889_v49 = vld [vmem:[#allocation3 + $0x70] sm:$0xff] }
 0x29b   : > { %v1906_v40 = vld [vmem:[#allocation3 + $0xf8] sm:$0xff] }
 0x29c   : > { %v2281_v48 = vpack.c.bf16 %v1906_v40, %v1905_v39 }
 0x29e   : > { %2283 = vmatprep.subr.msk.bf16.mxu0 %vm2944_vm11, %v2281_v48 }
 0x29f   : > { %v1890_v12 = vld [vmem:[#allocation3 + $0x78] sm:$0xff] }
 0x2a0   : > { %v2284_v51 = vpack.c.bf16 %v1890_v12, %v1889_v49 }
 0x2a2   : > { %2286 = vmatpush3.bf16.xpose.msk.msra.mxu0 %vm2944_vm11, %v2284_v51 }
 0x2a9   : > { %2238 = vmatmul.mubr.msk.f32.vlgmr.msra.gmra.mrb[0].mxu0 %vm1907_vm10, %v3403_v30 }
 0x37c   : > { %v2073_v52 = vpop.f32.mrb[0].mxu0 }
 0x37d   : > { %v2082_v20 = vmul.f32 %v2073_v52, %v2073_v52  ;;  %v2075_v17 = vpop.f32.mrb[1].mxu0 }
 0x37e   : > { %v2078_v60 = vadd.f32 %v2075_v17, %v2073_v52  ;;  %v2083_v11 = vmul.f32 %v2075_v17, %v2075_v17 }
 0x380   : > { %v2084_v18 = vadd.f32 %v2083_v11, %v2082_v20  ;;  %2079 = vadd.xlane.f32.xlu0 %v2078_v60 }
 0x382   : > { %2085 = vadd.xlane.f32.xlu1 %v2084_v18 }
 0x40d   : > { %v2080_v32 = vpop.xlane.xlu0 %2079 }
 0x40e   : > { %v2081_v31 = vmul.f32 0.00390625, %v2080_v32 }
 0x40f   : > { %v2086_v26 = vpop.xlane.xlu1 %2085 }
 0x410   : > { %v2087_v47 = vmul.f32 0.00390625, %v2086_v26  ;;  %v2088_v59 = vmul.f32 %v2081_v31, %v2081_v31  ;;  %v2090_v53 = vsub.f32 %v2073_v52, %v2081_v31  ;;  %v2091_v46 = vsub.f32 %v2075_v17, %v2081_v31 }
 0x412   : > { %v2089_v63 = vsub.f32 %v2087_v47, %v2088_v59 }
 0x414   : > { %v2092_v43 = vadd.f32 1e-05, %v2089_v63 }
 0x416   : > { %2304 = vrsqrt.f32 %v2092_v43 }
 0x420   : > { %v2305_v30 = vpop.eup %2304 }
 0x421   : > { %v2094_v0 = vmul.f32 %v2305_v30, %v2090_v53  ;;  %v2095_v14 = vmul.f32 %v2305_v30, %v2091_v46 }
 0x423   : > { %vm2096_vm12 = vcmp.ge.f32.partialorder %v2094_v0, 0.0  ;;  %vm2097_vm13 = vcmp.ge.f32.partialorder %v2095_v14, 0.0  ;;  %v2098_v42 = vmul.f32 0.2, %v2094_v0  ;;  %v2099_v8 = vmul.f32 0.2, %v2095_v14 }
 0x425   : > { %v2100_v61 = vsel %vm2096_vm12, %v2094_v0, %v2098_v42  ;;  %v2101_v57 = vsel %vm2097_vm13, %v2095_v14, %v2099_v8 }
 0x426   : > { %2102 = vst [vmem:[%s143_s29] sm:$0xff] %v2100_v61  ;;  %2103 = vst [vmem:[%s143_s29 + $0x8] sm:$0xff] %v2101_v57 }
 0x427 PF: > { %s12_s9 = sadd.s32 1, %s2312_s9  }
 0x428   : > { %p9_p4 = scmp.ge.s32.totalorder %s12_s9, 4  }
 0x42a   :  { %11 = sbr.rel (!%p9_p4) target bundleno = 1 (0x1), region = 60 }

</bundles_post_ra>
